<compile_context>
chip_gen: v6e
topology: v6e:2x2x1
jax: 0.10.0
libtpu: 0.0.40
codegen_flags: <defaults>
</compile_context>

<pallas_src>
import functools

import jax
import jax.numpy as jnp
import numpy as np
from jax import lax
from jax.experimental import pallas as pl
from jax.experimental.pallas import tpu as pltpu


def _nonlocal_attn_kernel(
    x_ref,            # (1, HW, C)  full per-batch image, resident across q tiles
    w1_ref, b1_ref,   # match1:   (C, Cr), (1, Cr)
    w2_ref, b2_ref,   # match2:   (C, Cr), (1, Cr)
    wa_ref, ba_ref,   # assembly: (C, C),  (1, C)
    alpha_ref,        # SMEM (3,)  PReLU slopes [a1, a2, aa]
    o_ref,            # (1, TQ, C)
    e2_s,             # VMEM scratch (HW, Cr) bf16, persistent across q tiles
    asm_s,            # VMEM scratch (HW, C)  bf16, persistent across q tiles
    *, tq,
):
    def prelu(y, a):
        # min/max + multiply-add form (cheaper than compare+select on the VPU).
        return jnp.maximum(y, 0.0) + a * jnp.minimum(y, 0.0)

    # Hoisted key/value projections: compute once per batch element (first q tile only).
    @pl.when(pl.program_id(1) == 0)
    def _():
        x = x_ref[0]  # (HW, C) f32
        y2 = jnp.dot(x, w2_ref[...], preferred_element_type=jnp.float32) + b2_ref[...]
        e2_s[...] = prelu(y2, alpha_ref[1]).astype(e2_s.dtype)
        ya = jnp.dot(x, wa_ref[...], preferred_element_type=jnp.float32) + ba_ref[...]
        asm_s[...] = prelu(ya, alpha_ref[2]).astype(asm_s.dtype)

    # Query rows for the current tile, sliced straight out of the resident VMEM block
    # (no second HBM->VMEM DMA of the same data).
    row0 = pl.multiple_of(pl.program_id(1) * tq, tq)
    xq = x_ref[0, pl.ds(row0, tq), :]  # (TQ, C) f32
    e1 = prelu(
        jnp.dot(xq, w1_ref[...], preferred_element_type=jnp.float32) + b1_ref[...],
        alpha_ref[0],
    ).astype(jnp.bfloat16)  # (TQ, Cr)

    # score[i, j] = <e1[i], e2[j]> : contract the channel (last) dim of both operands
    # (native MXU lhs.rhs^T form, no transposed copy of e2).
    score = lax.dot_general(
        e1, e2_s[...],
        dimension_numbers=(((1,), (1,)), ((), ())),
        preferred_element_type=jnp.float32,
    )  # (TQ, HW) f32

    # Row softmax (f32), normalisation deferred until after the aggregation matmul.
    m = jnp.max(score, axis=-1, keepdims=True)
    p = jnp.exp(score - m)
    denom = jnp.sum(p, axis=-1, keepdims=True)

    out = jnp.dot(p.astype(jnp.bfloat16), asm_s[...],
                  preferred_element_type=jnp.float32)          # (TQ, C) f32
    out = out * pl.reciprocal(denom, approx=True)
    o_ref[0] = out.astype(o_ref.dtype)


def _pick_tq(hw, target=512):
    """Largest power-of-two query-row tile <= target that divides HW (>=8)."""
    for t in (512, 256, 128, 64, 32, 16, 8):
        if t <= target and hw % t == 0:
            return t
    return hw  # fall back to one tile == full extent (always a legal block)


def nonlocal_attention_pallas(x_nchw, params, *, tq=None):
    """x_nchw: (N, C, H, W) float32. params: dict of weights/biases/PReLU slopes."""
    N, C, H, W = x_nchw.shape
    HW = H * W
    Cr = params["w1"].shape[1]

    if tq is None:
        tq = _pick_tq(HW)
    assert HW % tq == 0 and (tq % 8 == 0 or tq == HW), (HW, tq)
    nq = HW // tq

    # NCHW -> (N, HW, C): C is the lane-dense last dim for all kernel loads/stores.
    x = jnp.transpose(x_nchw, (0, 2, 3, 1)).reshape(N, HW, C).astype(jnp.float32)

    # PReLU slopes as a tiny SMEM-resident scalar vector [a1, a2, aa].
    alphas = jnp.concatenate(
        [params["a1"].reshape(-1), params["a2"].reshape(-1), params["aa"].reshape(-1)]
    ).astype(jnp.float32)

    full2d = lambda shape: pl.BlockSpec(shape, lambda n, q: (0, 0))

    out = pl.pallas_call(
        functools.partial(_nonlocal_attn_kernel, tq=tq),
        out_shape=jax.ShapeDtypeStruct((N, HW, C), jnp.float32),
        grid_spec=pltpu.PrefetchScalarGridSpec(
            num_scalar_prefetch=0,
            grid=(N, nq),
            in_specs=[
                # full per-batch image (block index constant along q -> stays resident;
                # query rows are sliced from this block inside the kernel)
                pl.BlockSpec((1, HW, C), lambda n, q: (n, 0, 0)),
                full2d((C, Cr)), full2d((1, Cr)),   # match1
                full2d((C, Cr)), full2d((1, Cr)),   # match2
                full2d((C, C)),  full2d((1, C)),    # assembly
                pl.BlockSpec(memory_space=pltpu.MemorySpace.SMEM),  # PReLU slopes
            ],
            out_specs=pl.BlockSpec((1, tq, C), lambda n, q: (n, q, 0)),
            scratch_shapes=[
                pltpu.VMEM((HW, Cr), jnp.bfloat16),  # e2 (keys), bf16 for the MXU
                pltpu.VMEM((HW, C), jnp.bfloat16),   # assembly (values)
            ],
        ),
        compiler_params=pltpu.CompilerParams(
            # q axis must be sequential per batch (persistent e2/asm scratch carry);
            # batch axis can be sharded across TensorCores.
            dimension_semantics=("parallel", "arbitrary"),
            vmem_limit_bytes=48 * 1024 * 1024,
        ),
    )(
        x,
        params["w1"], params["b1"],
        params["w2"], params["b2"],
        params["wa"], params["ba"],
        alphas,
    )

    # (N, HW, C) -> NCHW
    return jnp.transpose(out.reshape(N, H, W, C), (0, 3, 1, 2))


def nonlocal_attention_ref(x_nchw, params, *, mixed_precision=False):
    """Pure-JAX reference mirroring the PyTorch forward.

    With mixed_precision=True the big-matmul operands are cast to bf16 (f32 accumulate)
    exactly like the kernel, so the comparison isolates structural correctness.
    """
    N, C, H, W = x_nchw.shape
    HW = H * W
    x = jnp.transpose(x_nchw, (0, 2, 3, 1)).reshape(N, HW, C)

    def proj(w, b, a):
        y = x @ w + b
        return jnp.where(y >= 0.0, y, a * y)

    e1 = proj(params["w1"], params["b1"], params["a1"])   # (N, HW, Cr)
    e2 = proj(params["w2"], params["b2"], params["a2"])   # (N, HW, Cr)
    asm = proj(params["wa"], params["ba"], params["aa"])  # (N, HW, C)

    if mixed_precision:
        e1 = e1.astype(jnp.bfloat16)
        e2 = e2.astype(jnp.bfloat16)
        asm_mm = asm.astype(jnp.bfloat16)
    else:
        asm_mm = asm

    score = jnp.einsum("nic,njc->nij", e1, e2,
                       preferred_element_type=jnp.float32)
    m = jnp.max(score, axis=-1, keepdims=True)
    p = jnp.exp(score - m)
    denom = jnp.sum(p, axis=-1, keepdims=True)
    p_mm = p.astype(jnp.bfloat16) if mixed_precision else p
    out = jnp.einsum("nij,njc->nic", p_mm, asm_mm,
                     preferred_element_type=jnp.float32) / denom
    return jnp.transpose(out.reshape(N, H, W, C), (0, 3, 1, 2))


def make_params(key, channel, reduction):
    cr = channel // reduction
    keys = jax.random.split(key, 6)
    # PyTorch conv weights are (Cout, Cin, 1, 1); stored here as (Cin, Cout) for x @ W.
    scale = 0.1
    return {
        "w1": scale * jax.random.normal(keys[0], (channel, cr), jnp.float32),
        "b1": scale * jax.random.normal(keys[1], (1, cr), jnp.float32),
        "a1": jnp.full((1, 1), 0.25, jnp.float32),   # PReLU default slope
        "w2": scale * jax.random.normal(keys[2], (channel, cr), jnp.float32),
        "b2": scale * jax.random.normal(keys[3], (1, cr), jnp.float32),
        "a2": jnp.full((1, 1), 0.25, jnp.float32),
        "wa": scale * jax.random.normal(keys[4], (channel, channel), jnp.float32),
        "ba": scale * jax.random.normal(keys[5], (1, channel), jnp.float32),
        "aa": jnp.full((1, 1), 0.25, jnp.float32),
    }


if __name__ == "__main__":
    key = jax.random.PRNGKey(0)
    k_x, k_p = jax.random.split(key)

    # Module default: channel=128, reduction=2 (Cr=64); small 16x16 spatial -> HW=256.
    N, C, H, W = 2, 128, 16, 16
    x = jax.random.normal(k_x, (N, C, H, W), jnp.float32)
    params = make_params(k_p, channel=C, reduction=2)

    # tq=64 -> grid=(2, 4): exercises the per-batch scratch init + multi-tile q loop.
    out = jax.block_until_ready(nonlocal_attention_pallas(x, params, tq=64))
    assert out.shape == (N, C, H, W)

    # Compare against a reference that mirrors the kernel's bf16-operand / f32-accum
    # matmuls (the f32 forward differs from the bf16 MXU path by ~1e-3 relative).
    ref = jax.block_until_ready(
        nonlocal_attention_ref(x, params, mixed_precision=True))
    np.testing.assert_allclose(np.asarray(out), np.asarray(ref),
                               rtol=2e-2, atol=2e-2)
    print("KERNEL_OK")
</pallas_src>

<mosaic_0001>
module attributes {stable_mosaic.version = 11 : i64} {
  func.func @_nonlocal_attn_kernel(%arg0: i32, %arg1: i32, %arg2: memref<1x256x128xf32, #tpu.memory_space<vmem>>, %arg3: memref<128x64xf32, #tpu.memory_space<vmem>>, %arg4: memref<1x64xf32, #tpu.memory_space<vmem>>, %arg5: memref<128x64xf32, #tpu.memory_space<vmem>>, %arg6: memref<1x64xf32, #tpu.memory_space<vmem>>, %arg7: memref<128x128xf32, #tpu.memory_space<vmem>>, %arg8: memref<1x128xf32, #tpu.memory_space<vmem>>, %arg9: memref<3xf32, #tpu.memory_space<smem>>, %arg10: memref<1x64x128xf32, #tpu.memory_space<vmem>>, %arg11: memref<256x64xbf16, #tpu.memory_space<vmem>>, %arg12: memref<256x128xbf16, #tpu.memory_space<vmem>>) attributes {dimension_semantics = [#tpu.dimension_semantics<parallel>, #tpu.dimension_semantics<arbitrary>], iteration_bounds = array<i64: 2, 4>, scalar_prefetch = 0 : i64, scratch_operands = 2 : i64, tpu.core_type = #tpu.core_type<tc>, window_params = [{transform_indices = @transform_0, window_bounds = array<i64: 1, 256, 128>}, {pipeline_mode = #tpu.pipeline_mode<synchronous>, transform_indices = @transform_1, window_bounds = array<i64: 128, 64>}, {pipeline_mode = #tpu.pipeline_mode<synchronous>, transform_indices = @transform_2, window_bounds = array<i64: 1, 64>}, {pipeline_mode = #tpu.pipeline_mode<synchronous>, transform_indices = @transform_3, window_bounds = array<i64: 128, 64>}, {pipeline_mode = #tpu.pipeline_mode<synchronous>, transform_indices = @transform_4, window_bounds = array<i64: 1, 64>}, {pipeline_mode = #tpu.pipeline_mode<synchronous>, transform_indices = @transform_5, window_bounds = array<i64: 128, 128>}, {pipeline_mode = #tpu.pipeline_mode<synchronous>, transform_indices = @transform_6, window_bounds = array<i64: 1, 128>}, {transform_indices = @transform_7, window_bounds = array<i64: 3>}, {transform_indices = @transform_8, window_bounds = array<i64: 1, 64, 128>}]} {
    %c0_i32 = arith.constant 0 : i32
    %0 = arith.cmpi eq, %arg1, %c0_i32 : i32
    %1 = arith.extui %0 : i1 to i32
    %c0_i32_0 = arith.constant 0 : i32
    %2 = arith.cmpi ne, %1, %c0_i32_0 : i32
    scf.if %2 {
      %c0_20 = arith.constant 0 : index
      %c0_21 = arith.constant 0 : index
      %c0_22 = arith.constant 0 : index
      %40 = vector.load %arg2[%c0_20, %c0_21, %c0_22] : memref<1x256x128xf32, #tpu.memory_space<vmem>>, vector<1x256x128xf32>
      %41 = vector.shape_cast %40 : vector<1x256x128xf32> to vector<256x128xf32>
      %c0_23 = arith.constant 0 : index
      %c0_24 = arith.constant 0 : index
      %42 = vector.load %arg5[%c0_23, %c0_24] : memref<128x64xf32, #tpu.memory_space<vmem>>, vector<128x64xf32>
      %cst_25 = arith.constant dense<0.000000e+00> : vector<256x64xf32>
      %43 = tpu.matmul %41, %42, %cst_25 {dimension_numbers = #tpu.dot_dimension_numbers<[1], [0], [0], [1], [0, 0, 1, 1], [], []>} : vector<256x128xf32>, vector<128x64xf32>, vector<256x64xf32> -> vector<256x64xf32>
      %c0_26 = arith.constant 0 : index
      %c0_27 = arith.constant 0 : index
      %44 = vector.load %arg6[%c0_26, %c0_27] : memref<1x64xf32, #tpu.memory_space<vmem>>, vector<1x64xf32>
      %45 = vector.broadcast %44 : vector<1x64xf32> to vector<256x64xf32>
      %46 = arith.addf %43, %45 : vector<256x64xf32>
      %c1 = arith.constant 1 : index
      %47 = memref.load %arg9[%c1] : memref<3xf32, #tpu.memory_space<smem>>
      %cst_28 = arith.constant 0.000000e+00 : f32
      %48 = vector.broadcast %cst_28 : f32 to vector<256x64xf32>
      %49 = arith.maximumf %46, %48 : vector<256x64xf32>
      %cst_29 = arith.constant 0.000000e+00 : f32
      %50 = vector.broadcast %cst_29 : f32 to vector<256x64xf32>
      %51 = arith.minimumf %46, %50 : vector<256x64xf32>
      %52 = vector.broadcast %47 : f32 to vector<256x64xf32>
      %53 = arith.mulf %52, %51 : vector<256x64xf32>
      %54 = arith.addf %49, %53 : vector<256x64xf32>
      %55 = arith.truncf %54 : vector<256x64xf32> to vector<256x64xbf16>
      %c0_30 = arith.constant 0 : index
      %c0_31 = arith.constant 0 : index
      %56 = vector.load %arg11[%c0_30, %c0_31] : memref<256x64xbf16, #tpu.memory_space<vmem>>, vector<256x64xbf16>
      tpu.vector_store %arg11[%c0_30, %c0_31], %55 {strides = array<i32>} : memref<256x64xbf16, #tpu.memory_space<vmem>>, vector<256x64xbf16>,
      %c0_32 = arith.constant 0 : index
      %c0_33 = arith.constant 0 : index
      %57 = vector.load %arg7[%c0_32, %c0_33] : memref<128x128xf32, #tpu.memory_space<vmem>>, vector<128x128xf32>
      %cst_34 = arith.constant dense<0.000000e+00> : vector<256x128xf32>
      %58 = tpu.matmul %41, %57, %cst_34 {dimension_numbers = #tpu.dot_dimension_numbers<[1], [0], [0], [1], [0, 0, 1, 1], [], []>} : vector<256x128xf32>, vector<128x128xf32>, vector<256x128xf32> -> vector<256x128xf32>
      %c0_35 = arith.constant 0 : index
      %c0_36 = arith.constant 0 : index
      %59 = vector.load %arg8[%c0_35, %c0_36] : memref<1x128xf32, #tpu.memory_space<vmem>>, vector<1x128xf32>
      %60 = vector.broadcast %59 : vector<1x128xf32> to vector<256x128xf32>
      %61 = arith.addf %58, %60 : vector<256x128xf32>
      %c2 = arith.constant 2 : index
      %62 = memref.load %arg9[%c2] : memref<3xf32, #tpu.memory_space<smem>>
      %cst_37 = arith.constant 0.000000e+00 : f32
      %63 = vector.broadcast %cst_37 : f32 to vector<256x128xf32>
      %64 = arith.maximumf %61, %63 : vector<256x128xf32>
      %cst_38 = arith.constant 0.000000e+00 : f32
      %65 = vector.broadcast %cst_38 : f32 to vector<256x128xf32>
      %66 = arith.minimumf %61, %65 : vector<256x128xf32>
      %67 = vector.broadcast %62 : f32 to vector<256x128xf32>
      %68 = arith.mulf %67, %66 : vector<256x128xf32>
      %69 = arith.addf %64, %68 : vector<256x128xf32>
      %70 = arith.truncf %69 : vector<256x128xf32> to vector<256x128xbf16>
      %c0_39 = arith.constant 0 : index
      %c0_40 = arith.constant 0 : index
      %71 = vector.load %arg12[%c0_39, %c0_40] : memref<256x128xbf16, #tpu.memory_space<vmem>>, vector<256x128xbf16>
      tpu.vector_store %arg12[%c0_39, %c0_40], %70 {strides = array<i32>} : memref<256x128xbf16, #tpu.memory_space<vmem>>, vector<256x128xbf16>,
    } else {
    }
    %c64_i32 = arith.constant 64 : i32
    %3 = arith.muli %arg1, %c64_i32 : i32
    %4 = tpu.assume_multiple %3, 64 : i32
    %c0 = arith.constant 0 : index
    %5 = arith.index_cast %4 : i32 to index
    %c0_1 = arith.constant 0 : index
    %6 = vector.load %arg2[%c0, %5, %c0_1] : memref<1x256x128xf32, #tpu.memory_space<vmem>>, vector<1x64x128xf32>
    %7 = vector.shape_cast %6 : vector<1x64x128xf32> to vector<64x128xf32>
    %c0_2 = arith.constant 0 : index
    %c0_3 = arith.constant 0 : index
    %8 = vector.load %arg3[%c0_2, %c0_3] : memref<128x64xf32, #tpu.memory_space<vmem>>, vector<128x64xf32>
    %cst = arith.constant dense<0.000000e+00> : vector<64x64xf32>
    %9 = tpu.matmul %7, %8, %cst {dimension_numbers = #tpu.dot_dimension_numbers<[1], [0], [0], [1], [0, 0, 1, 1], [], []>} : vector<64x128xf32>, vector<128x64xf32>, vector<64x64xf32> -> vector<64x64xf32>
    %c0_4 = arith.constant 0 : index
    %c0_5 = arith.constant 0 : index
    %10 = vector.load %arg4[%c0_4, %c0_5] : memref<1x64xf32, #tpu.memory_space<vmem>>, vector<1x64xf32>
    %11 = vector.broadcast %10 : vector<1x64xf32> to vector<64x64xf32>
    %12 = arith.addf %9, %11 : vector<64x64xf32>
    %c0_6 = arith.constant 0 : index
    %13 = memref.load %arg9[%c0_6] : memref<3xf32, #tpu.memory_space<smem>>
    %cst_7 = arith.constant 0.000000e+00 : f32
    %14 = vector.broadcast %cst_7 : f32 to vector<64x64xf32>
    %15 = arith.maximumf %12, %14 : vector<64x64xf32>
    %cst_8 = arith.constant 0.000000e+00 : f32
    %16 = vector.broadcast %cst_8 : f32 to vector<64x64xf32>
    %17 = arith.minimumf %12, %16 : vector<64x64xf32>
    %18 = vector.broadcast %13 : f32 to vector<64x64xf32>
    %19 = arith.mulf %18, %17 : vector<64x64xf32>
    %20 = arith.addf %15, %19 : vector<64x64xf32>
    %21 = arith.truncf %20 : vector<64x64xf32> to vector<64x64xbf16>
    %c0_9 = arith.constant 0 : index
    %c0_10 = arith.constant 0 : index
    %22 = vector.load %arg11[%c0_9, %c0_10] : memref<256x64xbf16, #tpu.memory_space<vmem>>, vector<256x64xbf16>
    %cst_11 = arith.constant dense<0.000000e+00> : vector<64x256xf32>
    %23 = tpu.matmul %21, %22, %cst_11 {dimension_numbers = #tpu.dot_dimension_numbers<[1], [1], [0], [0], [0, 0, 1, 0], [], []>} : vector<64x64xbf16>, vector<256x64xbf16>, vector<64x256xf32> -> vector<64x256xf32>
    %cst_12 = arith.constant dense<0xFF800000> : vector<64xf32>
    %24 = vector.multi_reduction <maximumf>, %23, %cst_12 [1] : vector<64x256xf32> to vector<64xf32>
    %25 = vector.shape_cast %24 : vector<64xf32> to vector<64x1xf32>
    %26 = vector.broadcast %25 : vector<64x1xf32> to vector<64x256xf32>
    %27 = arith.subf %23, %26 : vector<64x256xf32>
    %28 = math.exp %27 : vector<64x256xf32>
    %cst_13 = arith.constant dense<0.000000e+00> : vector<64xf32>
    %29 = vector.multi_reduction <add>, %28, %cst_13 [1] : vector<64x256xf32> to vector<64xf32>
    %30 = vector.shape_cast %29 : vector<64xf32> to vector<64x1xf32>
    %31 = arith.truncf %28 : vector<64x256xf32> to vector<64x256xbf16>
    %c0_14 = arith.constant 0 : index
    %c0_15 = arith.constant 0 : index
    %32 = vector.load %arg12[%c0_14, %c0_15] : memref<256x128xbf16, #tpu.memory_space<vmem>>, vector<256x128xbf16>
    %cst_16 = arith.constant dense<0.000000e+00> : vector<64x128xf32>
    %33 = tpu.matmul %31, %32, %cst_16 {dimension_numbers = #tpu.dot_dimension_numbers<[1], [0], [0], [1], [0, 0, 1, 1], [], []>} : vector<64x256xbf16>, vector<256x128xbf16>, vector<64x128xf32> -> vector<64x128xf32>
    %34 = tpu.reciprocal %30 {approx = true} : vector<64x1xf32> -> vector<64x1xf32>
    %35 = vector.broadcast %34 : vector<64x1xf32> to vector<64x128xf32>
    %36 = arith.mulf %33, %35 : vector<64x128xf32>
    %c0_17 = arith.constant 0 : index
    %c0_18 = arith.constant 0 : index
    %c0_19 = arith.constant 0 : index
    %37 = vector.load %arg10[%c0_17, %c0_18, %c0_19] : memref<1x64x128xf32, #tpu.memory_space<vmem>>, vector<1x64x128xf32>
    %38 = vector.shape_cast %37 : vector<1x64x128xf32> to vector<64x128xf32>
    %39 = vector.shape_cast %36 : vector<64x128xf32> to vector<1x64x128xf32>
    tpu.vector_store %arg10[%c0_17, %c0_18, %c0_19], %39 {strides = array<i32>} : memref<1x64x128xf32, #tpu.memory_space<vmem>>, vector<1x64x128xf32>,
    return
  }
  func.func @transform_0(%arg0: i32, %arg1: i32) -> (i32, i32, i32) {
    %c0_i32 = arith.constant 0 : i32
    %c0_i32_0 = arith.constant 0 : i32
    %c0_i32_1 = arith.constant 0 : i32
    return %arg0, %c0_i32, %c0_i32_0 : i32, i32, i32
  }
  func.func @transform_1(%arg0: i32, %arg1: i32) -> (i32, i32) {
    %c0_i32 = arith.constant 0 : i32
    %c0_i32_0 = arith.constant 0 : i32
    %c0_i32_1 = arith.constant 0 : i32
    return %c0_i32, %c0_i32_0 : i32, i32
  }
  func.func @transform_2(%arg0: i32, %arg1: i32) -> (i32, i32) {
    %c0_i32 = arith.constant 0 : i32
    %c0_i32_0 = arith.constant 0 : i32
    %c0_i32_1 = arith.constant 0 : i32
    return %c0_i32, %c0_i32_0 : i32, i32
  }
  func.func @transform_3(%arg0: i32, %arg1: i32) -> (i32, i32) {
    %c0_i32 = arith.constant 0 : i32
    %c0_i32_0 = arith.constant 0 : i32
    %c0_i32_1 = arith.constant 0 : i32
    return %c0_i32, %c0_i32_0 : i32, i32
  }
  func.func @transform_4(%arg0: i32, %arg1: i32) -> (i32, i32) {
    %c0_i32 = arith.constant 0 : i32
    %c0_i32_0 = arith.constant 0 : i32
    %c0_i32_1 = arith.constant 0 : i32
    return %c0_i32, %c0_i32_0 : i32, i32
  }
  func.func @transform_5(%arg0: i32, %arg1: i32) -> (i32, i32) {
    %c0_i32 = arith.constant 0 : i32
    %c0_i32_0 = arith.constant 0 : i32
    %c0_i32_1 = arith.constant 0 : i32
    return %c0_i32, %c0_i32_0 : i32, i32
  }
  func.func @transform_6(%arg0: i32, %arg1: i32) -> (i32, i32) {
    %c0_i32 = arith.constant 0 : i32
    %c0_i32_0 = arith.constant 0 : i32
    %c0_i32_1 = arith.constant 0 : i32
    return %c0_i32, %c0_i32_0 : i32, i32
  }
  func.func @transform_7(%arg0: i32, %arg1: i32) -> i32 {
    %c0_i32 = arith.constant 0 : i32
    %c0_i32_0 = arith.constant 0 : i32
    return %c0_i32 : i32
  }
  func.func @transform_8(%arg0: i32, %arg1: i32) -> (i32, i32, i32) {
    %c0_i32 = arith.constant 0 : i32
    %c0_i32_0 = arith.constant 0 : i32
    return %arg0, %arg1, %c0_i32 : i32, i32, i32
  }
}

</mosaic_0001>

<bundles_post_ra>
// kernel: tpu_custom_call.1
= control target key start
LH: loop header
LB: loop body
LE: loop exit
PB: predicated region body
PF: predicated region fallthrough
CT: control target
= control target key end

     0   :  { %s4161_s0 = inlined_call_operand.hbm [shape: f32[2,256,128], index: 0, kind: input, shape index: {}]   ;;  %s4162_s1 = inlined_call_operand.vmem [shape: f32[128,64], index: 1, kind: input, shape index: {}]   ;;  %s4163_s2 = inlined_call_operand.vmem [shape: f32[1,64], index: 2, kind: input, shape index: {}]   ;;  %s4164_s3 = inlined_call_operand.vmem [shape: f32[128,64], index: 3, kind: input, shape index: {}]   ;;  %s4165_s4 = inlined_call_operand.vmem [shape: f32[1,64], index: 4, kind: input, shape index: {}]   ;;  %s4166_s5 = inlined_call_operand.vmem [shape: f32[128,128], index: 5, kind: input, shape index: {}]   ;;  %s4167_s6 = inlined_call_operand.vmem [shape: f32[1,128], index: 6, kind: input, shape index: {}]   ;;  %s4168_s7 = inlined_call_operand.vmem [shape: f32[3], index: 7, kind: input, shape index: {}]   ;;  %s4169_s8 = inlined_call_operand.hbm [shape: f32[2,256,128], index: 8, kind: output, shape index: {}]  }
   0x1   :  { %4181 = sst [smem:[#allocation18_spill]] %s4162_s1 }
   0x2   :  { %4182 = sst [smem:[#allocation19_spill]] %s4163_s2 }
   0x3   :  { %4183 = sst [smem:[#allocation20_spill]] %s4165_s4 }
   0x4   :  { %4184 = sst [smem:[#allocation21_spill]] %s4167_s6 }
   0x5   :  { %4185 = sst [smem:[#allocation22_spill]] %s4168_s7 }
   0x6   :  { %4186 = sst [smem:[#allocation23_spill]] %s4169_s8 }
   0x7   :  { %13 = vsyncpa [#allocation5], 0 }
   0x8   :  { %15 = vsyncpa [#allocation5 + $0x1], 0 }
   0x9   :  { %16 = vsyncpa [#allocation7], 0 }
   0xa   :  { %17 = vsyncpa [#allocation6], 0 }
   0xb   :  { %19 = vsyncpa [#allocation6 + $0x1], 0  ;;  %s3426_s27 = smov 0   ;;  %s3428_s28 = smov 0  }
   0xc   :  { %s3430_s29 = smov 0   ;;  %s3432_s30 = smov 0  }
   0xd   :  { %s3434_s9 = smov 0   ;;  %s3436_s10 = smov 0  }
   0xe   :  { %s3438_s11 = smov 0   ;;  %s3440_s12 = smov 0  }
   0xf   :  { %s3442_s13 = smov 0   ;;  %s3444_s14 = smov 0  }
  0x10   :  { %s3446_s15 = smov 0  }
  0x11 LB: > { %4187 = sst [smem:[#allocation13_spill]] %s3332_s27  ;;  %s2327_s16 = sadd.s32 4294967295, %s3372_s15   ;;  %s3372_s15 = sphi %s3446_s15, %s25_s15   ;;  %s3368_s14 = sphi %s3444_s14, %s4224_s14   ;;  %s3364_s13 = sphi %s3442_s13, %s4223_s13   ;;  %s3360_s12 = sphi %s3440_s12, %s4222_s12   ;;  %s3356_s11 = sphi %s3438_s11, %s4221_s11   ;;  %s3352_s10 = sphi %s3436_s10, %s4220_s10   ;;  %s3348_s9 = sphi %s3434_s9, %s4219_s9   ;;  %s3344_s30 = sphi %s3432_s30, %s4218_s30   ;;  %s3340_s29 = sphi %s3430_s29, %s4217_s29   ;;  %s3336_s28 = sphi %s3428_s28, %s4216_s28   ;;  %s3332_s27 = sphi %s3426_s27, %s4215_s27  }
  0x12   : > { %4188 = sst [smem:[#allocation14_spill]] %s3360_s12  ;;  %s2328_s17 = sadd.s32 4294967294, %s3372_s15  }
  0x13   : > { %4189 = sst [smem:[#allocation15_spill]] %s3372_s15  ;;  %p51_p0 = scmp.ne.s32.totalorder %s3352_s10, %s3348_s9 }
  0x14   : > { %p52_p1 = scmp.eq.s32.totalorder %s3372_s15, 0  ;;  %p57_p2 = scmp.ne.s32.totalorder %s3348_s9, %s3344_s30 }
  0x15   : > { %p3486_p3 = scmp.eq.s32.totalorder %s2327_s16, 0  ;;  %p229_p5 = scmp.ne.s32.totalorder %s3340_s29, %s3336_s28 }
  0x16   : > { %p3490_p4 = por %p52_p1, %p51_p0  ;;  %p230_p7 = scmp.eq.s32.totalorder %s2327_s16, 7 }
  0x17   : > { %p3498_p6 = por %p3486_p3, %p57_p2  ;;  %p235_p8 = scmp.ne.s32.totalorder %s3336_s28, %s3332_s27 }
  0x18   : > { %p236_p9 = scmp.eq.s32.totalorder %s2328_s17, 7  ;;  %p3504_p10 = por %p230_p7, %p229_p5 }
  0x19   : > { %s4192_s21 = scalar_select %p3498_p6, 1, 0 }
  0x1a   : > { %s4193_s22 = scalar_select %p3504_p10, 1, 0 }
  0x1b   : > { %p2329_p11 = scmp.ge.s32.totalorder %s3372_s15, 1  ;;  %p3509_p12 = por %p236_p9, %p235_p8 }
  0x1c   : > { %4194 = sst [smem:[#allocation16_spill]] %s4193_s22  ;;  %p243_p13 = scmp.lt.s32.totalorder %s3372_s15, 9 }
  0x1d   : > { %s4195_s23 = scalar_select %p3509_p12, 1, 0 }
  0x1e   : > { %s4197_s7 = sld [smem:[#allocation22_spill]]  ;;  %p3517_p0 = pnand %p2329_p11, %p243_p13 }
  0x1f   : > { %4196 = sst [smem:[#allocation17_spill]] %s4195_s23  ;;  %p3029_p2 = scmp.lt.s32.totalorder %s3372_s15, 8 }
  0x20   : > { %s4198_s30 = scalar_select %p3517_p0, 1, 0 }
  0x21   : > { %p3016_p1 = pneg %p3517_p0  ;;  %p3528_p7 = pnand %p3029_p2, %p3490_p4 }
  0x23   : > { %p3017_p5 = pnand %p3016_p1, %p3486_p3 }
  0x24   : > { %s274_s26 = sshll.u32 %s4197_s7, 4  ;;  %s275_s26 = int_to_ptr.vmem [resolvable:$true] %s274_s26 }
  0x25   : > { %s3205_s17 = scalar_lea.vmem %s275_s26, 16  ;;  %p3207_p9 = pneg %p3017_p5 }
  0x26   : > { %p3206_p8 = scmp.ne.s32.totalorder %s275_s26, %s3205_s17  ;;  %p3213_p13 = scmp.lt.s32.totalorder %s275_s26, %s275_s26 }
  0x27   : > { %p3214_p10 = scmp.lt.s32.totalorder %s3205_s17, %s3205_s17 }
  0x28   : > { %p3208_p12 = pnand %p3207_p9, %p3206_p8 }
  0x29   : > { %p3215_p6 = por %p3214_p10, %p3213_p13 }
  0x2a   : > { %p3209_p11 = pneg %p3208_p12 }
  0x2c   : > { %p3216_p0 = pnand %p3215_p6, %p3209_p11 }
  0x2e   : > { %3219 = shalt.err (!%p3216_p0)
}
  0x2f   : > { %s3374_s24 = smov [#allocation8]   ;;  %s34_s20 = sadd.s32 1, %s3364_s13 }
  0x30   : > { %3019 = dma.vmem_to_smem (!%p3017_p5), %s275_s26, 16, %s3374_s24, [#allocation7]  }
  0x31   : > { %s37_s25 = sadd.s32 1, %s3368_s14  ;;  %p35_p4 = scmp.ge.s32.totalorder %s34_s20, 4 }
  0x32   : > { %s285_s18 = sand.u32 1, %s3352_s10   ;;  %s219_s7 = sadd.s32 1, %s3340_s29 }
  0x33   : > { %s2332_s17 = sshll.u32 %s285_s18, 8  ;;  %s4226_s20 = smov (%p35_p4, %s34_s20), 0 }
  0x34   : > { %s4228_s25 = smov (!%p35_p4, %s37_s25), %s3368_s14  ;;  %s2452_s23 = sshll.u32 %s3368_s14, 12 }
  0x35   : > { %p39_p6 = scmp.ge.s32.totalorder %s4228_s25, 2  ;;  %s215_s27 = ssub.s32 %s3364_s13, %s4226_s20 }
  0x36   : > { %s289_s15 = scalar_lea.vmem [#allocation4], %s2332_s17  ;;  %s3547_s22 = scalar_lea.hbm %s4161_s0, %s2452_s23 }
  0x37   : > { %s296_s26 = sshll.u32 %s289_s15, 4  ;;  %s4230_s25 = smov (%p39_p6, %s4228_s25), 0  ;;  %s297_s26 = int_to_ptr.vmem [resolvable:$true] %s296_s26 }
  0x38   : > { %s41_s12 = ssub.s32 %s3368_s14, %s4230_s25  ;;  %s4200_s1 = sadd.s32 1, %s3352_s10 }
  0x39   : > { %p42_p10 = scmp.eq.s32.totalorder %s41_s12, 0  ;;  %s216_s2 = sor.u32 %s215_s27, %s41_s12 }
  0x3a   : > { %p217_p12 = scmp.eq.s32.totalorder %s216_s2, 0  ;;  %s286_s17 = scalar_lea.sflag [#allocation5], %s285_s18 }
  0x3b   : > { %s3554_s6 = scalar_select %p42_p10, %s3352_s10, %s4200_s1  }
  0x3c   : > { %s3557_s4 = scalar_select %p217_p12, %s3340_s29, %s219_s7  }
  0x3d   : > { %p3222_p0 = pneg %p3528_p7  ;;  %s3233_s15 = scalar_lea.vmem %s297_s26, 4096 }
  0x3e   : > { %p3234_p1 = scmp.ne.s32.totalorder %s297_s26, %s3233_s15  ;;  %s3375_s8 = smov [#allocation4]  }
  0x3f   : > { %s3238_s23 = sshll.u32 %s3375_s8, 4  ;;  %s3239_s23 = int_to_ptr.vmem [resolvable:$false] %s3238_s23 }
  0x40   : > { %p3236_p2 = pnand %p3234_p1, %p3222_p0  ;;  %s3240_s24 = scalar_lea.vmem %s3239_s23, 8192 }
  0x41   : > { %p3241_p8 = scmp.lt.s32.totalorder %s297_s26, %s3239_s23  ;;  %p3242_p9 = scmp.lt.s32.totalorder %s3240_s24, %s3233_s15 }
  0x42   : > { %p3237_p5 = pneg %p3236_p2 }
  0x43   : > { %p3243_p11 = por %p3242_p9, %p3241_p8 }
  0x45   : > { %p3244_p13 = pnand %p3243_p11, %p3237_p5 }
  0x47   : > { %3247 = shalt.err (!%p3244_p13)
}
  0x48   : > { %s3376_s1 = smov 128   ;;  %s3377_s2 = smov 8  }
  0x49   : > { %3023 = dma.hbm_to_vmem [thread:$0]  (!%p3528_p7), %s3547_s22, 4096, %s297_s26, %s286_s17, %s3376_s1, %s3376_s1, %s3377_s2  }
  0x4a   : > { %p4201_p4 = scmp.ne.s32.totalorder %s4198_s30, 0 }
  0x4b   : > { %s310_s7 = sand.u32 (!%p4201_p4), 1, %s3348_s9   ;;  %p4202_p6 = scmp.ne.s32.totalorder (!%p4201_p4), %s4192_s21, 0 }
  0x4c   : > { %308 = sbr.rel (%p4201_p4) target bundleno = 1268 (0x4f4), region = 52  ;;  %s2336_s27 = sshll.u32 (!%p4201_p4), %s310_s7, 8 }
  0x4d   : > { %s311_s12 = scalar_lea.sflag (!%p4201_p4), [#allocation5], %s310_s7  ;;  %s3567_s18 = scalar_lea.vmem (!%p4201_p4), [#allocation4], %s2336_s27 }
  0x51   : > { %3319 = dma.done.wait (%p4202_p6), %s311_s12, 4096  }
  0x52   : > { %3321 = vsyncadd (%p4202_p6), %s311_s12, 4294963200 }
  0x53   : > { %3323 = dma.done.wait (%p3486_p3), [#allocation7], 16  }
  0x54   : > { %3325 = vsyncadd (%p3486_p3), [#allocation7], 4294967280 }
  0x55   : > { %323 = sfence }
  0x56   : > { %s349_s22 = sand.u32 1, %s3336_s28   ;;  %p2339_p7 = scmp.ne.s32.totalorder %s3356_s11, 0 }
  0x57   : > { %s2338_s30 = sshll.u32 %s349_s22, 6  ;;  %s2341_s1 = sld [smem:[#allocation8 + $0x1]] (!%p2339_p7) }
  0x58   : > { %s3580_s16 = scalar_lea.vmem [#allocation9], %s2338_s30  ;;  %357 = sbr.rel (%p2339_p7) target bundleno = 420 (0x1a4), region = 64 }
  0x59   : > { %s2375_s2 = sld [smem:[#allocation8 + $0x2]] (!%p2339_p7) }
  0x5a   : > { %s4203_s12 = sld [smem:[#allocation20_spill]] (!%p2339_p7) }
  0x5b   : > { %s4204_s21 = sld [smem:[#allocation21_spill]] (!%p2339_p7) }
  0x5d   : > { %v405_v0 = vld [vmem:[%s4164_s3 + $0x78] sm:$0xff]  ;;  %v404_v2 = vld [vmem:[%s4164_s3 + $0x70] sm:$0xff]  ;;  %v403_v4 = vld [vmem:[%s4164_s3 + $0x68] sm:$0xff]  ;;  %vm896_vm0 = vcmask 519168  }
  0x5e   : > { %v944_v1 = vld [vmem:[%s4166_s5 + $0x78] sm:$0xff]  ;;  %2796 = vmatprep.subr.mxu0 %v405_v0  ;;  %v943_v3 = vld [vmem:[%s4166_s5 + $0x70] sm:$0xff]  ;;  %v942_v5 = vld [vmem:[%s4166_s5 + $0x68] sm:$0xff] }
  0x5f   : > { %2876 = vmatprep.subr.mxu1 %v944_v1  ;;  %2797 = vmatpush3.msra.mxu0 %v405_v0  ;;  %v402_v6 = vld [vmem:[%s4164_s3 + $0x60] sm:$0xff]  ;;  %v401_v8 = vld [vmem:[%s4164_s3 + $0x58] sm:$0xff]  ;;  %v400_v10 = vld [vmem:[%s4164_s3 + $0x50] sm:$0xff] }
  0x60   : > { %2877 = vmatpush3.msra.mxu1 %v944_v1  ;;  %2798 = vmatprep.subr.mxu0 %v404_v2  ;;  %v941_v7 = vld [vmem:[%s4166_s5 + $0x60] sm:$0xff]  ;;  %v940_v9 = vld [vmem:[%s4166_s5 + $0x58] sm:$0xff]  ;;  %v939_v11 = vld [vmem:[%s4166_s5 + $0x50] sm:$0xff] }
  0x61   : > { %2878 = vmatprep.subr.mxu1 %v943_v3  ;;  %2799 = vmatpush3.msra.mxu0 %v404_v2  ;;  %v399_v12 = vld [vmem:[%s4164_s3 + $0x48] sm:$0xff]  ;;  %v398_v14 = vld [vmem:[%s4164_s3 + $0x40] sm:$0xff]  ;;  %v397_v16 = vld [vmem:[%s4164_s3 + $0x38] sm:$0xff] }
  0x62   : > { %2879 = vmatpush3.msra.mxu1 %v943_v3  ;;  %2800 = vmatprep.subr.mxu0 %v403_v4  ;;  %v938_v13 = vld [vmem:[%s4166_s5 + $0x48] sm:$0xff]  ;;  %v937_v15 = vld [vmem:[%s4166_s5 + $0x40] sm:$0xff]  ;;  %v936_v17 = vld [vmem:[%s4166_s5 + $0x38] sm:$0xff] }
  0x63   : > { %2880 = vmatprep.subr.mxu1 %v942_v5  ;;  %2801 = vmatpush3.msra.mxu0 %v403_v4  ;;  %v396_v18 = vld [vmem:[%s4164_s3 + $0x30] sm:$0xff]  ;;  %v395_v20 = vld [vmem:[%s4164_s3 + $0x28] sm:$0xff]  ;;  %v394_v22 = vld [vmem:[%s4164_s3 + $0x20] sm:$0xff] }
  0x64   : > { %2881 = vmatpush3.msra.mxu1 %v942_v5  ;;  %2802 = vmatprep.subr.mxu0 %v402_v6  ;;  %v935_v19 = vld [vmem:[%s4166_s5 + $0x30] sm:$0xff]  ;;  %v934_v21 = vld [vmem:[%s4166_s5 + $0x28] sm:$0xff]  ;;  %v933_v23 = vld [vmem:[%s4166_s5 + $0x20] sm:$0xff] }
  0x65   : > { %2882 = vmatprep.subr.mxu1 %v941_v7  ;;  %2803 = vmatpush3.msra.mxu0 %v402_v6  ;;  %v393_v24 = vld [vmem:[%s4164_s3 + $0x18] sm:$0xff]  ;;  %v392_v26 = vld [vmem:[%s4164_s3 + $0x10] sm:$0xff]  ;;  %v391_v28 = vld [vmem:[%s4164_s3 + $0x8] sm:$0xff]  ;;  %v3723_v6 = vstv %s2341_s1 }
  0x66   : > { %2883 = vmatpush3.msra.mxu1 %v941_v7  ;;  %2804 = vmatprep.subr.mxu0 %v401_v8  ;;  %v932_v25 = vld [vmem:[%s4166_s5 + $0x18] sm:$0xff]  ;;  %v931_v27 = vld [vmem:[%s4166_s5 + $0x10] sm:$0xff]  ;;  %v930_v29 = vld [vmem:[%s4166_s5 + $0x8] sm:$0xff]  ;;  %v3725_v7 = vstv %s2375_s2 }
  0x67   : > { %2884 = vmatprep.subr.mxu1 %v940_v9  ;;  %2805 = vmatpush3.msra.mxu0 %v401_v8  ;;  %v390_v30 = vld [vmem:[%s4164_s3] sm:$0xff]  ;;  %v359_v33 = vld [vmem:[%s3567_s18 + $0x8] sm:$0xff]  ;;  %v360_v34 = vld [vmem:[%s3567_s18 + $0x10] sm:$0xff] }
  0x68   : > { %2885 = vmatpush3.msra.mxu1 %v940_v9  ;;  %2806 = vmatprep.subr.mxu0 %v400_v10  ;;  %v929_v31 = vld [vmem:[%s4166_s5] sm:$0xff]  ;;  %v361_v35 = vld [vmem:[%s3567_s18 + $0x18] sm:$0xff]  ;;  %v363_v37 = vld [vmem:[%s3567_s18 + $0x28] sm:$0xff] }
  0x69   : > { %2886 = vmatprep.subr.mxu1 %v939_v11  ;;  %2807 = vmatpush3.msra.mxu0 %v400_v10  ;;  %v358_v32 = vld [vmem:[%s3567_s18] sm:$0xff]  ;;  %v364_v38 = vld [vmem:[%s3567_s18 + $0x30] sm:$0xff]  ;;  %v365_v39 = vld [vmem:[%s3567_s18 + $0x38] sm:$0xff] }
  0x6a   : > { %2887 = vmatpush3.msra.mxu1 %v939_v11  ;;  %2808 = vmatprep.subr.mxu0 %v399_v12  ;;  %v362_v36 = vld [vmem:[%s3567_s18 + $0x20] sm:$0xff]  ;;  %v367_v41 = vld [vmem:[%s3567_s18 + $0x48] sm:$0xff]  ;;  %v368_v42 = vld [vmem:[%s3567_s18 + $0x50] sm:$0xff] }
  0x6b   : > { %2888 = vmatprep.subr.mxu1 %v938_v13  ;;  %2809 = vmatpush3.msra.mxu0 %v399_v12  ;;  %v366_v40 = vld [vmem:[%s3567_s18 + $0x40] sm:$0xff]  ;;  %v369_v43 = vld [vmem:[%s3567_s18 + $0x58] sm:$0xff]  ;;  %v371_v45 = vld [vmem:[%s3567_s18 + $0x68] sm:$0xff] }
  0x6c   : > { %2889 = vmatpush3.msra.mxu1 %v938_v13  ;;  %2810 = vmatprep.subr.mxu0 %v398_v14  ;;  %v370_v44 = vld [vmem:[%s3567_s18 + $0x60] sm:$0xff]  ;;  %v372_v46 = vld [vmem:[%s3567_s18 + $0x70] sm:$0xff]  ;;  %v373_v47 = vld [vmem:[%s3567_s18 + $0x78] sm:$0xff] }
  0x6d   : > { %2890 = vmatprep.subr.mxu1 %v937_v15  ;;  %2811 = vmatpush3.msra.mxu0 %v398_v14  ;;  %v374_v48 = vld [vmem:[%s3567_s18 + $0x80] sm:$0xff]  ;;  %v375_v49 = vld [vmem:[%s3567_s18 + $0x88] sm:$0xff]  ;;  %v376_v50 = vld [vmem:[%s3567_s18 + $0x90] sm:$0xff] }
  0x6e   : > { %2891 = vmatpush3.msra.mxu1 %v937_v15  ;;  %2812 = vmatprep.subr.mxu0 %v397_v16  ;;  %v377_v51 = vld [vmem:[%s3567_s18 + $0x98] sm:$0xff]  ;;  %v378_v52 = vld [vmem:[%s3567_s18 + $0xa0] sm:$0xff]  ;;  %v379_v53 = vld [vmem:[%s3567_s18 + $0xa8] sm:$0xff] }
  0x6f   : > { %2892 = vmatprep.subr.mxu1 %v936_v17  ;;  %2813 = vmatpush3.msra.mxu0 %v397_v16  ;;  %v380_v54 = vld [vmem:[%s3567_s18 + $0xb0] sm:$0xff]  ;;  %v381_v55 = vld [vmem:[%s3567_s18 + $0xb8] sm:$0xff]  ;;  %v382_v56 = vld [vmem:[%s3567_s18 + $0xc0] sm:$0xff] }
  0x70   : > { %2893 = vmatpush3.msra.mxu1 %v936_v17  ;;  %2814 = vmatprep.subr.mxu0 %v396_v18  ;;  %v383_v57 = vld [vmem:[%s3567_s18 + $0xc8] sm:$0xff]  ;;  %v384_v58 = vld [vmem:[%s3567_s18 + $0xd0] sm:$0xff]  ;;  %v385_v59 = vld [vmem:[%s3567_s18 + $0xd8] sm:$0xff] }
  0x71   : > { %2894 = vmatprep.subr.mxu1 %v935_v19  ;;  %2815 = vmatpush3.msra.mxu0 %v396_v18  ;;  %v386_v60 = vld [vmem:[%s3567_s18 + $0xe0] sm:$0xff]  ;;  %v387_v61 = vld [vmem:[%s3567_s18 + $0xe8] sm:$0xff]  ;;  %v388_v62 = vld [vmem:[%s3567_s18 + $0xf0] sm:$0xff] }
  0x72   : > { %2895 = vmatpush3.msra.mxu1 %v935_v19  ;;  %2816 = vmatprep.subr.mxu0 %v395_v20  ;;  %v389_v63 = vld [vmem:[%s3567_s18 + $0xf8] sm:$0xff]  ;;  %v3714_v0 = vld [vmem:[%s4203_s12] ss:$0 sm:$0xff] }
  0x73   : > { %2896 = vmatprep.subr.mxu1 %v934_v21  ;;  %2817 = vmatpush3.msra.mxu0 %v395_v20  ;;  %v3719_v1 = vld [vmem:[%s4204_s21] ss:$0 sm:$0xff] }
  0x74   : > { %2897 = vmatpush3.msra.mxu1 %v934_v21  ;;  %2818 = vmatprep.subr.mxu0 %v394_v22 }
  0x75   : > { %2898 = vmatprep.subr.mxu1 %v933_v23  ;;  %2819 = vmatpush3.msra.mxu0 %v394_v22 }
  0x76   : > { %2899 = vmatpush3.msra.mxu1 %v933_v23  ;;  %2820 = vmatprep.subr.mxu0 %v393_v24 }
  0x77   : > { %2900 = vmatprep.subr.mxu1 %v932_v25  ;;  %2821 = vmatpush3.msra.mxu0 %v393_v24 }
  0x78   : > { %2901 = vmatpush3.msra.mxu1 %v932_v25  ;;  %2822 = vmatprep.subr.mxu0 %v392_v26 }
  0x79   : > { %2902 = vmatprep.subr.mxu1 %v931_v27  ;;  %2823 = vmatpush3.msra.mxu0 %v392_v26 }
  0x7a   : > { %2903 = vmatpush3.msra.mxu1 %v931_v27  ;;  %2824 = vmatprep.subr.mxu0 %v391_v28 }
  0x7b   : > { %2904 = vmatprep.subr.mxu1 %v930_v29  ;;  %2825 = vmatpush3.msra.mxu0 %v391_v28 }
  0x7c   : > { %2905 = vmatpush3.msra.mxu1 %v930_v29  ;;  %2826 = vmatprep.subr.mxu0 %v390_v30 }
  0x7d   : > { %2906 = vmatprep.subr.mxu1 %v929_v31  ;;  %2827 = vmatpush3.msra.mxu0 %v390_v30 }
  0x7e   : > { %2828 = vmatprep.mubr.f32.mxu0 %v358_v32  ;;  %2907 = vmatpush3.msra.mxu1 %v929_v31 }
  0x7f   : > { %2908 = vmatprep.mubr.f32.mxu1 %v358_v32  ;;  %2829 = vmatmul.mubr.f32.vlgmr.msra.gmra.mxu0 %v359_v33 }
  0x80   : > { %2909 = vmatmul.mubr.f32.vlgmr.msra.gmra.mxu1 %v359_v33  ;;  %2831 = vmatprep.mubr.f32.mxu0 %v360_v34 }
  0x81   : > { %2911 = vmatprep.mubr.f32.mxu1 %v360_v34 }
  0x83   : > { %2832 = vmatmul.mubr.f32.gmra.mxu0 %v361_v35 }
  0x84   : > { %2912 = vmatmul.mubr.f32.gmra.mxu1 %v361_v35  ;;  %2834 = vmatprep.mubr.f32.mxu0 %v362_v36 }
  0x85   : > { %2914 = vmatprep.mubr.f32.mxu1 %v362_v36 }
  0x87   : > { %2835 = vmatmul.mubr.f32.gmra.mxu0 %v363_v37 }
  0x88   : > { %2915 = vmatmul.mubr.f32.gmra.mxu1 %v363_v37  ;;  %2837 = vmatprep.mubr.f32.mxu0 %v364_v38 }
  0x89   : > { %2917 = vmatprep.mubr.f32.mxu1 %v364_v38 }
  0x8b   : > { %2838 = vmatmul.mubr.f32.gmra.mxu0 %v365_v39 }
  0x8c   : > { %2918 = vmatmul.mubr.f32.gmra.mxu1 %v365_v39  ;;  %2840 = vmatprep.mubr.f32.mxu0 %v366_v40 }
  0x8d   : > { %2920 = vmatprep.mubr.f32.mxu1 %v366_v40 }
  0x8f   : > { %2841 = vmatmul.mubr.f32.gmra.mxu0 %v367_v41 }
  0x90   : > { %2921 = vmatmul.mubr.f32.gmra.mxu1 %v367_v41  ;;  %2843 = vmatprep.mubr.f32.mxu0 %v368_v42 }
  0x91   : > { %2923 = vmatprep.mubr.f32.mxu1 %v368_v42 }
  0x93   : > { %2844 = vmatmul.mubr.f32.gmra.mxu0 %v369_v43 }
  0x94   : > { %2924 = vmatmul.mubr.f32.gmra.mxu1 %v369_v43  ;;  %2846 = vmatprep.mubr.f32.mxu0 %v370_v44 }
  0x95   : > { %2926 = vmatprep.mubr.f32.mxu1 %v370_v44 }
  0x97   : > { %2847 = vmatmul.mubr.f32.gmra.mxu0 %v371_v45 }
  0x98   : > { %2927 = vmatmul.mubr.f32.gmra.mxu1 %v371_v45  ;;  %2849 = vmatprep.mubr.f32.mxu0 %v372_v46 }
  0x99   : > { %2929 = vmatprep.mubr.f32.mxu1 %v372_v46 }
  0x9b   : > { %2850 = vmatmul.mubr.f32.gmra.mxu0 %v373_v47 }
  0x9c   : > { %2930 = vmatmul.mubr.f32.gmra.mxu1 %v373_v47  ;;  %2852 = vmatprep.mubr.f32.mxu0 %v374_v48 }
  0x9d   : > { %2932 = vmatprep.mubr.f32.mxu1 %v374_v48 }
  0x9f   : > { %2853 = vmatmul.mubr.f32.gmra.mxu0 %v375_v49 }
  0xa0   : > { %2933 = vmatmul.mubr.f32.gmra.mxu1 %v375_v49  ;;  %2855 = vmatprep.mubr.f32.mxu0 %v376_v50 }
  0xa1   : > { %2935 = vmatprep.mubr.f32.mxu1 %v376_v50 }
  0xa3   : > { %2856 = vmatmul.mubr.f32.gmra.mxu0 %v377_v51 }
  0xa4   : > { %2936 = vmatmul.mubr.f32.gmra.mxu1 %v377_v51  ;;  %2858 = vmatprep.mubr.f32.mxu0 %v378_v52 }
  0xa5   : > { %2938 = vmatprep.mubr.f32.mxu1 %v378_v52 }
  0xa7   : > { %2859 = vmatmul.mubr.f32.gmra.mxu0 %v379_v53 }
  0xa8   : > { %2939 = vmatmul.mubr.f32.gmra.mxu1 %v379_v53  ;;  %2861 = vmatprep.mubr.f32.mxu0 %v380_v54 }
  0xa9   : > { %2941 = vmatprep.mubr.f32.mxu1 %v380_v54 }
  0xab   : > { %2862 = vmatmul.mubr.f32.gmra.mxu0 %v381_v55 }
  0xac   : > { %2942 = vmatmul.mubr.f32.gmra.mxu1 %v381_v55  ;;  %2864 = vmatprep.mubr.f32.mxu0 %v382_v56 }
  0xad   : > { %2944 = vmatprep.mubr.f32.mxu1 %v382_v56 }
  0xaf   : > { %2865 = vmatmul.mubr.f32.gmra.mxu0 %v383_v57 }
  0xb0   : > { %2945 = vmatmul.mubr.f32.gmra.mxu1 %v383_v57  ;;  %2867 = vmatprep.mubr.f32.mxu0 %v384_v58 }
  0xb1   : > { %2947 = vmatprep.mubr.f32.mxu1 %v384_v58 }
  0xb3   : > { %2868 = vmatmul.mubr.f32.gmra.mxu0 %v385_v59 }
  0xb4   : > { %2948 = vmatmul.mubr.f32.gmra.mxu1 %v385_v59  ;;  %2870 = vmatprep.mubr.f32.mxu0 %v386_v60 }
  0xb5   : > { %2950 = vmatprep.mubr.f32.mxu1 %v386_v60 }
  0xb7   : > { %2871 = vmatmul.mubr.f32.gmra.mxu0 %v387_v61 }
  0xb8   : > { %2951 = vmatmul.mubr.f32.gmra.mxu1 %v387_v61  ;;  %2873 = vmatprep.mubr.f32.mxu0 %v388_v62 }
  0xb9   : > { %2953 = vmatprep.mubr.f32.mxu1 %v388_v62 }
  0xbb   : > { %2874 = vmatmul.mubr.f32.gmra.mxu0 %v389_v63 }
  0xbc   : > { %2954 = vmatmul.mubr.f32.gmra.mxu1 %v389_v63 }
 0x13f   : > { %v2830_v2 = vpop.f32.mrf.mxu0 }
 0x140   : > { %v2910_v3 = vpop.f32.mrf.mxu1  ;;  %v485_v4 = vadd.f32 %v2830_v2, %v3714_v0 }
 0x141   : > { %v1024_v5 = vadd.f32 %v2910_v3, %v3719_v1  ;;  %v479_v8 = vpop.f32.mrf.mxu0 }
 0x142   : > { %v1018_v9 = vpop.f32.mrf.mxu1  ;;  %v672_v10 = vmin.f32 %v485_v4, 0.0  ;;  %v640_v12 = vmax.f32 %v485_v4, 0.0  ;;  %v480_v14 = vadd.f32 %v3714_v0, %v479_v8 }
 0x143   : > { %v1211_v11 = vmin.f32 %v1024_v5, 0.0  ;;  %v1179_v13 = vmax.f32 %v1024_v5, 0.0  ;;  %v1019_v15 = vadd.f32 %v3719_v1, %v1018_v9  ;;  %v2833_v16 = vpop.f32.mrf.mxu0 }
 0x144   : > { %v2913_v17 = vpop.f32.mrf.mxu1  ;;  %v705_v18 = vmul.f32 %v3723_v6, %v672_v10  ;;  %v495_v20 = vadd.f32 %v2833_v16, %v3714_v0  ;;  %v639_v22 = vmax.f32 %v480_v14, 0.0  ;;  %v671_v23 = vmin.f32 %v480_v14, 0.0 }
 0x145   : > { %v1244_v19 = vmul.f32 %v3725_v7, %v1211_v11  ;;  %v1034_v21 = vadd.f32 %v2913_v17, %v3719_v1  ;;  %v1210_v24 = vmin.f32 %v1019_v15, 0.0  ;;  %v489_v25 = vpop.f32.mrf.mxu0  ;;  %v1178_v29 = vmax.f32 %v1019_v15, 0.0 }
 0x146   : > { %v1028_v26 = vpop.f32.mrf.mxu1  ;;  %v737_v27 = vadd.f32 %v705_v18, %v640_v12  ;;  %v674_v30 = vmin.f32 %v495_v20, 0.0  ;;  %v704_v31 = vmul.f32 %v3723_v6, %v671_v23  ;;  %v642_v33 = vmax.f32 %v495_v20, 0.0 }
 0x147   : > { %v1276_v28 = vadd.f32 %v1244_v19, %v1179_v13  ;;  %v1243_v32 = vmul.f32 %v3725_v7, %v1210_v24  ;;  %v1213_v34 = vmin.f32 %v1034_v21, 0.0  ;;  %v2836_v35 = vpop.f32.mrf.mxu0  ;;  %v490_v39 = vadd.f32 %v3714_v0, %v489_v25 }
 0x148   : > { %v2916_v36 = vpop.f32.mrf.mxu1  ;;  %v2454_v37 = vpack.c.bf16 %v737_v27, %v737_v27  ;;  %v707_v38 = vmul.f32 %v3723_v6, %v674_v30  ;;  %v1029_v40 = vadd.f32 %v3719_v1, %v1028_v26  ;;  %v736_v41 = vadd.f32 %v704_v31, %v639_v22 }
 0x149   : > { %v1275_v42 = vadd.f32 %v1243_v32, %v1178_v29  ;;  %v1246_v43 = vmul.f32 %v3725_v7, %v1213_v34  ;;  %v505_v44 = vadd.f32 %v2836_v35, %v3714_v0  ;;  %v499_v45 = vpop.f32.mrf.mxu0  ;;  %v1181_v48 = vmax.f32 %v1034_v21, 0.0 }
 0x14a   : > { %v1038_v46 = vpop.f32.mrf.mxu1  ;;  %898 = vst.msk [vmem:[#allocation2 + $0x4] sm:$0xf] %vm896_vm0, %v2454_v37  ;;  %v739_v47 = vadd.f32 %v707_v38, %v642_v33  ;;  %v641_v49 = vmax.f32 %v490_v39, 0.0  ;;  %v673_v50 = vmin.f32 %v490_v39, 0.0  ;;  %v2453_v51 = vpack.c.bf16 %v736_v41, %v736_v41 }
 0x14b   : > { %v2520_v52 = vpack.c.bf16 %v1276_v28, %v1275_v42  ;;  %v1180_v53 = vmax.f32 %v1029_v40, 0.0  ;;  %v1212_v54 = vmin.f32 %v1029_v40, 0.0  ;;  %v2839_v55 = vpop.f32.mrf.mxu0  ;;  %v1278_v58 = vadd.f32 %v1246_v43, %v1181_v48 }
 0x14c   : > { %v2919_v56 = vpop.f32.mrf.mxu1  ;;  %v2456_v57 = vpack.c.bf16 %v739_v47, %v739_v47  ;;  %v706_v59 = vmul.f32 %v3723_v6, %v673_v50  ;;  %v676_v60 = vmin.f32 %v505_v44, 0.0  ;;  %897 = vst.msk [vmem:[#allocation2] sm:$0xf] %vm896_vm0, %v2453_v51  ;;  %v1044_v62 = vadd.f32 %v2916_v36, %v3719_v1 }
 0x14d   : > { %2521 = vst [vmem:[#allocation3] sm:$0xff] %v2520_v52   ;;  %v1245_v61 = vmul.f32 %v3725_v7, %v1212_v54  ;;  %v500_v63 = vadd.f32 %v3714_v0, %v499_v45  ;;  %v1039_v2 = vadd.f32 %v3719_v1, %v1038_v46  ;;  %v509_v3 = vpop.f32.mrf.mxu0  ;;  %v644_v8 = vmax.f32 %v505_v44, 0.0 }
 0x14e   : > { %v1048_v4 = vpop.f32.mrf.mxu1  ;;  %900 = vst.msk [vmem:[#allocation2 + $0xc] sm:$0xf] %vm896_vm0, %v2456_v57  ;;  %v738_v5 = vadd.f32 %v706_v59, %v641_v49  ;;  %v709_v9 = vmul.f32 %v3723_v6, %v676_v60  ;;  %v515_v10 = vadd.f32 %v2839_v55, %v3714_v0  ;;  %v1183_v12 = vmax.f32 %v1044_v62, 0.0 }
 0x14f   : > { %v1277_v11 = vadd.f32 %v1245_v61, %v1180_v53  ;;  %v1215_v13 = vmin.f32 %v1044_v62, 0.0  ;;  %v1054_v14 = vadd.f32 %v2919_v56, %v3719_v1  ;;  %v2842_v15 = vpop.f32.mrf.mxu0  ;;  %v643_v19 = vmax.f32 %v500_v63, 0.0 }
 0x150   : > { %v2922_v16 = vpop.f32.mrf.mxu1  ;;  %v2455_v17 = vpack.c.bf16 %v738_v5, %v738_v5  ;;  %v741_v18 = vadd.f32 %v709_v9, %v644_v8  ;;  %v675_v20 = vmin.f32 %v500_v63, 0.0  ;;  %v1182_v23 = vmax.f32 %v1039_v2, 0.0 }
 0x151   : > { %v2525_v21 = vpack.c.bf16 %v1278_v58, %v1277_v11  ;;  %v1248_v22 = vmul.f32 %v3725_v7, %v1215_v13  ;;  %v1214_v24 = vmin.f32 %v1039_v2, 0.0  ;;  %v519_v25 = vpop.f32.mrf.mxu0  ;;  %v646_v29 = vmax.f32 %v515_v10, 0.0 }
 0x152   : > { %v1058_v26 = vpop.f32.mrf.mxu1  ;;  %899 = vst.msk [vmem:[#allocation2 + $0x8] sm:$0xf] %vm896_vm0, %v2455_v17  ;;  %v2458_v27 = vpack.c.bf16 %v741_v18, %v741_v18  ;;  %v708_v28 = vmul.f32 %v3723_v6, %v675_v20  ;;  %v678_v30 = vmin.f32 %v515_v10, 0.0  ;;  %v1185_v32 = vmax.f32 %v1054_v14, 0.0 }
 0x153   : > { %2597 = vst [vmem:[#allocation3 + $0x8] sm:$0xff] %v2525_v21   ;;  %v1247_v31 = vmul.f32 %v3725_v7, %v1214_v24  ;;  %v1217_v33 = vmin.f32 %v1054_v14, 0.0  ;;  %v510_v34 = vadd.f32 %v3714_v0, %v509_v3  ;;  %v2845_v35 = vpop.f32.mrf.mxu0  ;;  %v1049_v39 = vadd.f32 %v3719_v1, %v1048_v4 }
 0x154   : > { %v2925_v36 = vpop.f32.mrf.mxu1  ;;  %902 = vst.msk [vmem:[#allocation2 + $0x14] sm:$0xf] %vm896_vm0, %v2458_v27  ;;  %v740_v37 = vadd.f32 %v708_v28, %v643_v19  ;;  %v711_v38 = vmul.f32 %v3723_v6, %v678_v30  ;;  %v525_v40 = vadd.f32 %v2842_v15, %v3714_v0  ;;  %v1280_v41 = vadd.f32 %v1248_v22, %v1183_v12 }
 0x155   : > { %v1279_v42 = vadd.f32 %v1247_v31, %v1182_v23  ;;  %v1250_v43 = vmul.f32 %v3725_v7, %v1217_v33  ;;  %v677_v44 = vmin.f32 %v510_v34, 0.0  ;;  %v529_v45 = vpop.f32.mrf.mxu0  ;;  %v645_v49 = vmax.f32 %v510_v34, 0.0 }
 0x156   : > { %v1068_v46 = vpop.f32.mrf.mxu1  ;;  %v2457_v47 = vpack.c.bf16 %v740_v37, %v740_v37  ;;  %v743_v48 = vadd.f32 %v711_v38, %v646_v29  ;;  %v1216_v50 = vmin.f32 %v1049_v39, 0.0  ;;  %v1184_v54 = vmax.f32 %v1049_v39, 0.0 }
 0x157   : > { %v2530_v51 = vpack.c.bf16 %v1280_v41, %v1279_v42  ;;  %v1282_v52 = vadd.f32 %v1250_v43, %v1185_v32  ;;  %v710_v53 = vmul.f32 %v3723_v6, %v677_v44  ;;  %v2848_v55 = vpop.f32.mrf.mxu0  ;;  %v680_v59 = vmin.f32 %v525_v40, 0.0 }
 0x158   : > { %v3762_v56 = vpop.f32.mrf.mxu1  ;;  %901 = vst.msk [vmem:[#allocation2 + $0x10] sm:$0xf] %vm896_vm0, %v2457_v47  ;;  %v2460_v57 = vpack.c.bf16 %v743_v48, %v743_v48  ;;  %v1249_v58 = vmul.f32 %v3725_v7, %v1216_v50  ;;  %v1064_v60 = vadd.f32 %v2922_v16, %v3719_v1  ;;  %v520_v62 = vadd.f32 %v3714_v0, %v519_v25 }
 0x159   : > { %2598 = vst [vmem:[#allocation3 + $0x10] sm:$0xff] %v2530_v51   ;;  %v742_v61 = vadd.f32 %v710_v53, %v645_v49  ;;  %v1059_v63 = vadd.f32 %v3719_v1, %v1058_v26  ;;  %v535_v2 = vadd.f32 %v2845_v35, %v3714_v0  ;;  %v539_v3 = vpop.f32.mrf.mxu0  ;;  %v648_v8 = vmax.f32 %v525_v40, 0.0 }
 0x15a   : > { %v3770_v4 = vpop.f32.mrf.mxu1  ;;  %904 = vst.msk [vmem:[#allocation2 + $0x1c] sm:$0xf] %vm896_vm0, %v2460_v57  ;;  %v1281_v5 = vadd.f32 %v1249_v58, %v1184_v54  ;;  %v713_v9 = vmul.f32 %v3723_v6, %v680_v59  ;;  %v1219_v10 = vmin.f32 %v1064_v60, 0.0  ;;  %v1187_v12 = vmax.f32 %v1064_v60, 0.0 }
 0x15b   : > { %v2459_v11 = vpack.c.bf16 %v742_v61, %v742_v61  ;;  %v647_v13 = vmax.f32 %v520_v62, 0.0  ;;  %v679_v14 = vmin.f32 %v520_v62, 0.0  ;;  %v2851_v15 = vpop.f32.mrf.mxu0  ;;  %v1218_v20 = vmin.f32 %v1059_v63, 0.0 }
 0x15c   : > { %v2931_v16 = vpop.f32.mrf.mxu1  ;;  %v2535_v17 = vpack.c.bf16 %v1282_v52, %v1281_v5  ;;  %v745_v18 = vadd.f32 %v713_v9, %v648_v8  ;;  %v1252_v19 = vmul.f32 %v3725_v7, %v1219_v10  ;;  %v1186_v22 = vmax.f32 %v1059_v63, 0.0 }
 0x15d   : > { %903 = vst.msk [vmem:[#allocation2 + $0x18] sm:$0xf] %vm896_vm0, %v2459_v11  ;;  %v712_v21 = vmul.f32 %v3723_v6, %v679_v14  ;;  %v682_v23 = vmin.f32 %v535_v2, 0.0  ;;  %v1074_v24 = vadd.f32 %v2925_v36, %v3719_v1  ;;  %v3778_v25 = vpop.f32.mrf.mxu0  ;;  %v1251_v28 = vmul.f32 %v3725_v7, %v1218_v20 }
 0x15e   : > { %v3780_v26 = vpop.f32.mrf.mxu1  ;;  %2599 = vst [vmem:[#allocation3 + $0x18] sm:$0xff] %v2535_v17   ;;  %v2462_v27 = vpack.c.bf16 %v745_v18, %v745_v18  ;;  %v650_v29 = vmax.f32 %v535_v2, 0.0  ;;  %v530_v30 = vadd.f32 %v3714_v0, %v529_v45  ;;  %v1284_v31 = vadd.f32 %v1252_v19, %v1187_v12 }
 0x15f   : > { %v744_v32 = vadd.f32 %v712_v21, %v647_v13  ;;  %v715_v33 = vmul.f32 %v3723_v6, %v682_v23  ;;  %v1221_v34 = vmin.f32 %v1074_v24, 0.0  ;;  %v3785_v35 = vpop.f32.mrf.mxu0  ;;  %v1283_v36 = vadd.f32 %v1251_v28, %v1186_v22 }
 0x160   : > { %v3787_v37 = vpop.f32.mrf.mxu1  ;;  %906 = vst.msk [vmem:[#allocation2 + $0x24] sm:$0xf] %vm896_vm0, %v2462_v27  ;;  %v1189_v38 = vmax.f32 %v1074_v24, 0.0  ;;  %v681_v39 = vmin.f32 %v530_v30, 0.0  ;;  %v1069_v40 = vadd.f32 %v3719_v1, %v1068_v46  ;;  %v545_v44 = vadd.f32 %v2848_v55, %v3714_v0 }
 0x161   : > { %v2461_v41 = vpack.c.bf16 %v744_v32, %v744_v32  ;;  %v747_v42 = vadd.f32 %v715_v33, %v650_v29  ;;  %v1254_v43 = vmul.f32 %v3725_v7, %v1221_v34  ;;  %v3793_v45 = vpop.f32.mrf.mxu0  ;;  %v2540_v48 = vpack.c.bf16 %v1284_v31, %v1283_v36 }
 0x162   : > { %v3795_v47 = vpop.f32.mrf.mxu1  ;;  %v649_v49 = vmax.f32 %v530_v30, 0.0  ;;  %v714_v50 = vmul.f32 %v3723_v6, %v681_v39  ;;  %v1220_v51 = vmin.f32 %v1069_v40, 0.0  ;;  %v1188_v46 = vmax.f32 %v1069_v40, 0.0 }
 0x163   : > { %905 = vst.msk [vmem:[#allocation2 + $0x20] sm:$0xf] %vm896_vm0, %v2461_v41  ;;  %v2464_v52 = vpack.c.bf16 %v747_v42, %v747_v42  ;;  %v1286_v53 = vadd.f32 %v1254_v43, %v1189_v38  ;;  %v684_v54 = vmin.f32 %v545_v44, 0.0  ;;  %v3799_v57 = vpop.f32.mrf.mxu0  ;;  %2600 = vst [vmem:[#allocation3 + $0x20] sm:$0xff] %v2540_v48   ;;  %v1084_v60 = vadd.f32 %v3762_v56, %v3719_v1 }
 0x164   : > { %v3801_v58 = vpop.f32.mrf.mxu1  ;;  %v746_v55 = vadd.f32 %v714_v50, %v649_v49  ;;  %v1253_v59 = vmul.f32 %v3725_v7, %v1220_v51  ;;  %v540_v61 = vadd.f32 %v3714_v0, %v539_v3  ;;  %v652_v62 = vmax.f32 %v545_v44, 0.0 }
 0x165   : > { %908 = vst.msk [vmem:[#allocation2 + $0x2c] sm:$0xf] %vm896_vm0, %v2464_v52  ;;  %v717_v63 = vmul.f32 %v3723_v6, %v684_v54  ;;  %v1079_v2 = vadd.f32 %v3719_v1, %v3770_v4  ;;  %v555_v5 = vadd.f32 %v2851_v15, %v3714_v0  ;;  %v3812_v8 = vpop.f32.mrf.mxu0  ;;  %v1223_v12 = vmin.f32 %v1084_v60, 0.0 }
 0x166   : > { %v3814_v9 = vpop.f32.mrf.mxu1  ;;  %v2463_v10 = vpack.c.bf16 %v746_v55, %v746_v55  ;;  %v1285_v11 = vadd.f32 %v1253_v59, %v1188_v46  ;;  %v1094_v56 = vadd.f32 %v2931_v16, %v3719_v1  ;;  %v1191_v13 = vmax.f32 %v1084_v60, 0.0 }
 0x167   : > { %v749_v3 = vadd.f32 %v717_v63, %v652_v62  ;;  %v651_v14 = vmax.f32 %v540_v61, 0.0  ;;  %v683_v17 = vmin.f32 %v540_v61, 0.0  ;;  %v1256_v4 = vmul.f32 %v3725_v7, %v1223_v12  ;;  %v3819_v20 = vpop.f32.mrf.mxu0 }
 0x168   : > { %907 = vst.msk [vmem:[#allocation2 + $0x28] sm:$0xf] %vm896_vm0, %v2463_v10  ;;  %v2545_v18 = vpack.c.bf16 %v1286_v53, %v1285_v11  ;;  %v1190_v19 = vmax.f32 %v1079_v2, 0.0  ;;  %v1222_v15 = vmin.f32 %v1079_v2, 0.0  ;;  %v654_v23 = vmax.f32 %v555_v5, 0.0  ;;  %v3822_v27 = vpop.f32.mrf.mxu1 }
 0x169   : > { %v2466_v21 = vpack.c.bf16 %v749_v3, %v749_v3  ;;  %v716_v22 = vmul.f32 %v3723_v6, %v683_v17  ;;  %v686_v24 = vmin.f32 %v555_v5, 0.0  ;;  %v1193_v28 = vmax.f32 %v1094_v56, 0.0  ;;  %v3834_v41 = vpop.f32.mrf.mxu0 }
 0x16a   : > { %2601 = vst [vmem:[#allocation3 + $0x28] sm:$0xff] %v2545_v18   ;;  %v1255_v16 = vmul.f32 %v3725_v7, %v1222_v15  ;;  %v1225_v29 = vmin.f32 %v1094_v56, 0.0  ;;  %v550_v30 = vadd.f32 %v3714_v0, %v3778_v25  ;;  %v1089_v33 = vadd.f32 %v3719_v1, %v3780_v26  ;;  %v3836_v48 = vpop.f32.mrf.mxu1 }
 0x16b   : > { %910 = vst.msk [vmem:[#allocation2 + $0x34] sm:$0xf] %vm896_vm0, %v2466_v21  ;;  %v748_v31 = vadd.f32 %v716_v22, %v651_v14  ;;  %v719_v32 = vmul.f32 %v3723_v6, %v686_v24  ;;  %v565_v34 = vadd.f32 %v3785_v35, %v3714_v0  ;;  %v1288_v36 = vadd.f32 %v1256_v4, %v1191_v13  ;;  %v2863_v61 = vpop.f32.mrf.mxu0 }
 0x16c   : > { %v1287_v38 = vadd.f32 %v1255_v16, %v1190_v19  ;;  %v1258_v39 = vmul.f32 %v3725_v7, %v1225_v29  ;;  %v685_v40 = vmin.f32 %v550_v30, 0.0  ;;  %v653_v43 = vmax.f32 %v550_v30, 0.0 }
 0x16d   : > { %v2465_v42 = vpack.c.bf16 %v748_v31, %v748_v31  ;;  %v751_v25 = vadd.f32 %v719_v32, %v654_v23  ;;  %v1224_v44 = vmin.f32 %v1089_v33, 0.0  ;;  %v1192_v51 = vmax.f32 %v1089_v33, 0.0  ;;  %v3856_v4 = vpop.f32.mrf.mxu0 }
 0x16e   : > { %v2550_v49 = vpack.c.bf16 %v1288_v36, %v1287_v38  ;;  %v1290_v50 = vadd.f32 %v1258_v39, %v1193_v28  ;;  %v718_v26 = vmul.f32 %v3723_v6, %v685_v40  ;;  %v688_v53 = vmin.f32 %v565_v34, 0.0 }
 0x16f   : > { %909 = vst.msk [vmem:[#allocation2 + $0x30] sm:$0xf] %vm896_vm0, %v2465_v42  ;;  %v2468_v35 = vpack.c.bf16 %v751_v25, %v751_v25  ;;  %v1257_v52 = vmul.f32 %v3725_v7, %v1224_v44  ;;  %v1104_v46 = vadd.f32 %v3787_v37, %v3719_v1  ;;  %v560_v55 = vadd.f32 %v3714_v0, %v3793_v45  ;;  %v2943_v37 = vpop.f32.mrf.mxu1  ;;  %v2866_v38 = vpop.f32.mrf.mxu0 }
 0x170   : > { %2602 = vst [vmem:[#allocation3 + $0x30] sm:$0xff] %v2550_v49   ;;  %v750_v54 = vadd.f32 %v718_v26, %v653_v43  ;;  %v1099_v59 = vadd.f32 %v3719_v1, %v3795_v47  ;;  %v575_v60 = vadd.f32 %v3799_v57, %v3714_v0  ;;  %v656_v63 = vmax.f32 %v565_v34, 0.0 }
 0x171   : > { %912 = vst.msk [vmem:[#allocation2 + $0x3c] sm:$0xf] %vm896_vm0, %v2468_v35  ;;  %v1289_v62 = vadd.f32 %v1257_v52, %v1192_v51  ;;  %v721_v2 = vmul.f32 %v3723_v6, %v688_v53  ;;  %v1227_v5 = vmin.f32 %v1104_v46, 0.0  ;;  %v1195_v11 = vmax.f32 %v1104_v46, 0.0  ;;  %v3861_v23 = vpop.f32.mrf.mxu1 }
 0x172   : > { %v2467_v10 = vpack.c.bf16 %v750_v54, %v750_v54  ;;  %v655_v12 = vmax.f32 %v560_v55, 0.0  ;;  %v687_v56 = vmin.f32 %v560_v55, 0.0  ;;  %v1226_v13 = vmin.f32 %v1099_v59, 0.0  ;;  %v599_v55 = vpop.f32.mrf.mxu0 }
 0x173   : > { %v2555_v45 = vpack.c.bf16 %v1290_v50, %v1289_v62  ;;  %v753_v3 = vadd.f32 %v721_v2, %v656_v63  ;;  %v1260_v47 = vmul.f32 %v3725_v7, %v1227_v5  ;;  %v1194_v14 = vmax.f32 %v1099_v59, 0.0  ;;  %v3871_v43 = vpop.f32.mrf.mxu1 }
 0x174   : > { %911 = vst.msk [vmem:[#allocation2 + $0x38] sm:$0xf] %vm896_vm0, %v2467_v10  ;;  %v720_v57 = vmul.f32 %v3723_v6, %v687_v56  ;;  %v690_v17 = vmin.f32 %v575_v60, 0.0  ;;  %v1114_v18 = vadd.f32 %v3801_v58, %v3719_v1  ;;  %v1259_v15 = vmul.f32 %v3725_v7, %v1226_v13  ;;  %v2869_v13 = vpop.f32.mrf.mxu0 }
 0x175   : > { %2603 = vst [vmem:[#allocation3 + $0x38] sm:$0xff] %v2555_v45   ;;  %v2470_v19 = vpack.c.bf16 %v753_v3, %v753_v3  ;;  %v658_v21 = vmax.f32 %v575_v60, 0.0  ;;  %v570_v22 = vadd.f32 %v3714_v0, %v3812_v8  ;;  %v1292_v24 = vadd.f32 %v1260_v47, %v1195_v11 }
 0x176   : > { %v752_v16 = vadd.f32 %v720_v57, %v655_v12  ;;  %v723_v28 = vmul.f32 %v3723_v6, %v690_v17  ;;  %v1229_v29 = vmin.f32 %v1114_v18, 0.0  ;;  %v1291_v58 = vadd.f32 %v1259_v15, %v1194_v14 }
 0x177   : > { %914 = vst.msk [vmem:[#allocation2 + $0x44] sm:$0xf] %vm896_vm0, %v2470_v19  ;;  %v1197_v30 = vmax.f32 %v1114_v18, 0.0  ;;  %v689_v31 = vmin.f32 %v570_v22, 0.0  ;;  %v1109_v32 = vadd.f32 %v3719_v1, %v3814_v9  ;;  %v585_v8 = vadd.f32 %v3819_v20, %v3714_v0 }
 0x178   : > { %v2469_v33 = vpack.c.bf16 %v752_v16, %v752_v16  ;;  %v755_v34 = vadd.f32 %v723_v28, %v658_v21  ;;  %v1262_v36 = vmul.f32 %v3725_v7, %v1229_v29  ;;  %v2560_v39 = vpack.c.bf16 %v1292_v24, %v1291_v58 }
 0x179   : > { %v657_v40 = vmax.f32 %v570_v22, 0.0  ;;  %v722_v42 = vmul.f32 %v3723_v6, %v689_v31  ;;  %v1228_v25 = vmin.f32 %v1109_v32, 0.0  ;;  %v1196_v9 = vmax.f32 %v1109_v32, 0.0  ;;  %v609_v32 = vpop.f32.mrf.mxu0 }
 0x17a   : > { %913 = vst.msk [vmem:[#allocation2 + $0x40] sm:$0xf] %vm896_vm0, %v2469_v33  ;;  %v2472_v44 = vpack.c.bf16 %v755_v34, %v755_v34  ;;  %v1294_v49 = vadd.f32 %v1262_v36, %v1197_v30  ;;  %v692_v50 = vmin.f32 %v585_v8, 0.0  ;;  %2604 = vst [vmem:[#allocation3 + $0x40] sm:$0xff] %v2560_v39   ;;  %v1124_v20 = vadd.f32 %v3822_v27, %v3719_v1  ;;  %v1138_v27 = vpop.f32.mrf.mxu1 }
 0x17b   : > { %v754_v26 = vadd.f32 %v722_v42, %v657_v40  ;;  %v1261_v51 = vmul.f32 %v3725_v7, %v1228_v25  ;;  %v580_v35 = vadd.f32 %v3714_v0, %v3834_v41  ;;  %v660_v52 = vmax.f32 %v585_v8, 0.0 }
 0x17c   : > { %916 = vst.msk [vmem:[#allocation2 + $0x4c] sm:$0xf] %vm896_vm0, %v2472_v44  ;;  %v725_v53 = vmul.f32 %v3723_v6, %v692_v50  ;;  %v1119_v46 = vadd.f32 %v3719_v1, %v3836_v48  ;;  %v595_v54 = vadd.f32 %v2863_v61, %v3714_v0  ;;  %v1231_v62 = vmin.f32 %v1124_v20, 0.0  ;;  %v2949_v18 = vpop.f32.mrf.mxu1 }
 0x17d   : > { %v2471_v59 = vpack.c.bf16 %v754_v26, %v754_v26  ;;  %v1293_v60 = vadd.f32 %v1261_v51, %v1196_v9  ;;  %v1134_v63 = vadd.f32 %v2943_v37, %v3719_v1  ;;  %v1199_v5 = vmax.f32 %v1124_v20, 0.0 }
 0x17e   : > { %v757_v2 = vadd.f32 %v725_v53, %v660_v52  ;;  %v659_v41 = vmax.f32 %v580_v35, 0.0  ;;  %v691_v10 = vmin.f32 %v580_v35, 0.0  ;;  %v1264_v12 = vmul.f32 %v3725_v7, %v1231_v62  ;;  %v1148_v39 = vpop.f32.mrf.mxu1  ;;  %v2872_v35 = vpop.f32.mrf.mxu0 }
 0x17f   : > { %915 = vst.msk [vmem:[#allocation2 + $0x48] sm:$0xf] %vm896_vm0, %v2471_v59  ;;  %v2565_v11 = vpack.c.bf16 %v1294_v49, %v1293_v60  ;;  %v1198_v56 = vmax.f32 %v1119_v46, 0.0  ;;  %v1230_v48 = vmin.f32 %v1119_v46, 0.0  ;;  %v662_v3 = vmax.f32 %v595_v54, 0.0 }
 0x180   : > { %v2474_v45 = vpack.c.bf16 %v757_v2, %v757_v2  ;;  %v724_v61 = vmul.f32 %v3723_v6, %v691_v10  ;;  %v694_v47 = vmin.f32 %v595_v54, 0.0  ;;  %v1201_v57 = vmax.f32 %v1134_v63, 0.0  ;;  %v2952_v54 = vpop.f32.mrf.mxu1 }
 0x181   : > { %2605 = vst [vmem:[#allocation3 + $0x48] sm:$0xff] %v2565_v11   ;;  %v1263_v37 = vmul.f32 %v3725_v7, %v1230_v48  ;;  %v1233_v14 = vmin.f32 %v1134_v63, 0.0  ;;  %v590_v17 = vadd.f32 %v3714_v0, %v3856_v4  ;;  %v1129_v21 = vadd.f32 %v3719_v1, %v3861_v23 }
 0x182   : > { %918 = vst.msk [vmem:[#allocation2 + $0x54] sm:$0xf] %vm896_vm0, %v2474_v45  ;;  %v756_v19 = vadd.f32 %v724_v61, %v659_v41  ;;  %v727_v15 = vmul.f32 %v3723_v6, %v694_v47  ;;  %v605_v22 = vadd.f32 %v2866_v38, %v3714_v0  ;;  %v1296_v24 = vadd.f32 %v1264_v12, %v1199_v5  ;;  %v1158_v47 = vpop.f32.mrf.mxu1 }
 0x183   : > { %v1295_v16 = vadd.f32 %v1263_v37, %v1198_v56  ;;  %v1266_v28 = vmul.f32 %v3725_v7, %v1233_v14  ;;  %v693_v29 = vmin.f32 %v590_v17, 0.0  ;;  %v661_v31 = vmax.f32 %v590_v17, 0.0  ;;  %v619_v56 = vpop.f32.mrf.mxu0 }
 0x184   : > { %v2473_v58 = vpack.c.bf16 %v756_v19, %v756_v19  ;;  %v759_v30 = vadd.f32 %v727_v15, %v662_v3  ;;  %v1232_v4 = vmin.f32 %v1129_v21, 0.0  ;;  %v1200_v8 = vmax.f32 %v1129_v21, 0.0 }
 0x185   : > { %v2570_v33 = vpack.c.bf16 %v1296_v24, %v1295_v16  ;;  %v1298_v34 = vadd.f32 %v1266_v28, %v1201_v57  ;;  %v726_v36 = vmul.f32 %v3723_v6, %v693_v29  ;;  %v696_v40 = vmin.f32 %v605_v22, 0.0  ;;  %v2875_v28 = vpop.f32.mrf.mxu0 }
 0x186   : > { %917 = vst.msk [vmem:[#allocation2 + $0x50] sm:$0xf] %vm896_vm0, %v2473_v58  ;;  %v2476_v23 = vpack.c.bf16 %v759_v30, %v759_v30  ;;  %v1265_v38 = vmul.f32 %v3725_v7, %v1232_v4  ;;  %v1144_v42 = vadd.f32 %v3871_v43, %v3719_v1  ;;  %v600_v44 = vadd.f32 %v3714_v0, %v599_v55  ;;  %v2955_v4 = vpop.f32.mrf.mxu1 }
 0x187   : > { %2606 = vst [vmem:[#allocation3 + $0x50] sm:$0xff] %v2570_v33   ;;  %v758_v25 = vadd.f32 %v726_v36, %v661_v31  ;;  %v1139_v49 = vadd.f32 %v3719_v1, %v1138_v27  ;;  %v615_v9 = vadd.f32 %v2869_v13, %v3714_v0  ;;  %v664_v26 = vmax.f32 %v605_v22, 0.0 }
 0x188   : > { %920 = vst.msk [vmem:[#allocation2 + $0x5c] sm:$0xf] %vm896_vm0, %v2476_v23  ;;  %v1297_v50 = vadd.f32 %v1265_v38, %v1200_v8  ;;  %v729_v51 = vmul.f32 %v3723_v6, %v696_v40  ;;  %v1235_v20 = vmin.f32 %v1144_v42, 0.0  ;;  %v1203_v53 = vmax.f32 %v1144_v42, 0.0 }
 0x189   : > { %v2475_v52 = vpack.c.bf16 %v758_v25, %v758_v25  ;;  %v663_v46 = vmax.f32 %v600_v44, 0.0  ;;  %v695_v43 = vmin.f32 %v600_v44, 0.0  ;;  %v1234_v62 = vmin.f32 %v1139_v49, 0.0 }
 0x18a   : > { %v2575_v59 = vpack.c.bf16 %v1298_v34, %v1297_v50  ;;  %v761_v60 = vadd.f32 %v729_v51, %v664_v26  ;;  %v1268_v55 = vmul.f32 %v3725_v7, %v1235_v20  ;;  %v1202_v27 = vmax.f32 %v1139_v49, 0.0  ;;  %v629_v50 = vpop.f32.mrf.mxu0 }
 0x18b   : > { %919 = vst.msk [vmem:[#allocation2 + $0x58] sm:$0xf] %vm896_vm0, %v2475_v52  ;;  %v728_v63 = vmul.f32 %v3723_v6, %v695_v43  ;;  %v698_v2 = vmin.f32 %v615_v9, 0.0  ;;  %v1154_v5 = vadd.f32 %v2949_v18, %v3719_v1  ;;  %v1267_v10 = vmul.f32 %v3725_v7, %v1234_v62  ;;  %v1168_v52 = vpop.f32.mrf.mxu1 }
 0x18c   : > { %2607 = vst [vmem:[#allocation3 + $0x58] sm:$0xff] %v2575_v59   ;;  %v2478_v41 = vpack.c.bf16 %v761_v60, %v761_v60  ;;  %v666_v11 = vmax.f32 %v615_v9, 0.0  ;;  %v610_v12 = vadd.f32 %v3714_v0, %v609_v32  ;;  %v1300_v48 = vadd.f32 %v1268_v55, %v1203_v53 }
 0x18d   : > { %v760_v45 = vadd.f32 %v728_v63, %v663_v46  ;;  %v731_v61 = vmul.f32 %v3723_v6, %v698_v2  ;;  %v1237_v3 = vmin.f32 %v1154_v5, 0.0  ;;  %v1299_v13 = vadd.f32 %v1267_v10, %v1202_v27 }
 0x18e   : > { %922 = vst.msk [vmem:[#allocation2 + $0x64] sm:$0xf] %vm896_vm0, %v2478_v41  ;;  %v1205_v37 = vmax.f32 %v1154_v5, 0.0  ;;  %v697_v57 = vmin.f32 %v610_v12, 0.0  ;;  %v1149_v14 = vadd.f32 %v3719_v1, %v1148_v39  ;;  %v625_v15 = vadd.f32 %v2872_v35, %v3714_v0 }
 0x18f   : > { %v2477_v17 = vpack.c.bf16 %v760_v45, %v760_v45  ;;  %v763_v18 = vadd.f32 %v731_v61, %v666_v11  ;;  %v1270_v19 = vmul.f32 %v3725_v7, %v1237_v3  ;;  %v2580_v21 = vpack.c.bf16 %v1300_v48, %v1299_v13 }
 0x190   : > { %v665_v22 = vmax.f32 %v610_v12, 0.0  ;;  %v730_v24 = vmul.f32 %v3723_v6, %v697_v57  ;;  %v1236_v16 = vmin.f32 %v1149_v14, 0.0  ;;  %v1204_v30 = vmax.f32 %v1149_v14, 0.0 }
 0x191   : > { %921 = vst.msk [vmem:[#allocation2 + $0x60] sm:$0xf] %vm896_vm0, %v2477_v17  ;;  %v2480_v29 = vpack.c.bf16 %v763_v18, %v763_v18  ;;  %v1302_v58 = vadd.f32 %v1270_v19, %v1205_v37  ;;  %v700_v31 = vmin.f32 %v625_v15, 0.0  ;;  %2608 = vst [vmem:[#allocation3 + $0x60] sm:$0xff] %v2580_v21   ;;  %v1164_v34 = vadd.f32 %v2952_v54, %v3719_v1 }
 0x192   : > { %v762_v32 = vadd.f32 %v730_v24, %v665_v22  ;;  %v1269_v33 = vmul.f32 %v3725_v7, %v1236_v16  ;;  %v620_v36 = vadd.f32 %v3714_v0, %v619_v56  ;;  %v668_v8 = vmax.f32 %v625_v15, 0.0 }
 0x193   : > { %924 = vst.msk [vmem:[#allocation2 + $0x6c] sm:$0xf] %vm896_vm0, %v2480_v29  ;;  %v733_v39 = vmul.f32 %v3723_v6, %v700_v31  ;;  %v1159_v23 = vadd.f32 %v3719_v1, %v1158_v47  ;;  %v635_v38 = vadd.f32 %v2875_v28, %v3714_v0  ;;  %v1239_v25 = vmin.f32 %v1164_v34, 0.0 }
 0x194   : > { %v2479_v40 = vpack.c.bf16 %v762_v32, %v762_v32  ;;  %v1301_v42 = vadd.f32 %v1269_v33, %v1204_v30  ;;  %v1174_v44 = vadd.f32 %v2955_v4, %v3719_v1  ;;  %v699_v9 = vmin.f32 %v620_v36, 0.0 }
 0x195   : > { %v765_v49 = vadd.f32 %v733_v39, %v668_v8  ;;  %v1207_v51 = vmax.f32 %v1164_v34, 0.0  ;;  %v1272_v20 = vmul.f32 %v3725_v7, %v1239_v25  ;;  %v1238_v35 = vmin.f32 %v1159_v23, 0.0 }
 0x196   : > { %923 = vst.msk [vmem:[#allocation2 + $0x68] sm:$0xf] %vm896_vm0, %v2479_v40  ;;  %v2585_v26 = vpack.c.bf16 %v1302_v58, %v1301_v42  ;;  %v667_v46 = vmax.f32 %v620_v36, 0.0  ;;  %v732_v43 = vmul.f32 %v3723_v6, %v699_v9  ;;  %v702_v54 = vmin.f32 %v635_v38, 0.0 }
 0x197   : > { %v2482_v53 = vpack.c.bf16 %v765_v49, %v765_v49  ;;  %v1206_v59 = vmax.f32 %v1159_v23, 0.0  ;;  %v1271_v60 = vmul.f32 %v3725_v7, %v1238_v35  ;;  %v1241_v55 = vmin.f32 %v1174_v44, 0.0 }
 0x198   : > { %2609 = vst [vmem:[#allocation3 + $0x68] sm:$0xff] %v2585_v26   ;;  %v630_v62 = vadd.f32 %v3714_v0, %v629_v50  ;;  %v764_v63 = vadd.f32 %v732_v43, %v667_v46  ;;  %v670_v27 = vmax.f32 %v635_v38, 0.0  ;;  %v735_v2 = vmul.f32 %v3723_v6, %v702_v54 }
 0x199   : > { %926 = vst.msk [vmem:[#allocation2 + $0x74] sm:$0xf] %vm896_vm0, %v2482_v53  ;;  %v1169_v5 = vadd.f32 %v3719_v1, %v1168_v52  ;;  %v1304_v41 = vadd.f32 %v1272_v20, %v1207_v51  ;;  %v1303_v10 = vadd.f32 %v1271_v60, %v1206_v59  ;;  %v1274_v48 = vmul.f32 %v3725_v7, %v1241_v55 }
 0x19a   : > { %v701_v11 = vmin.f32 %v630_v62, 0.0  ;;  %v2481_v12 = vpack.c.bf16 %v764_v63, %v764_v63  ;;  %v767_v56 = vadd.f32 %v735_v2, %v670_v27  ;;  %v669_v3 = vmax.f32 %v630_v62, 0.0 }
 0x19b   : > { %v1240_v45 = vmin.f32 %v1169_v5, 0.0  ;;  %v2590_v61 = vpack.c.bf16 %v1304_v41, %v1303_v10  ;;  %v1209_v13 = vmax.f32 %v1174_v44, 0.0  ;;  %v1208_v37 = vmax.f32 %v1169_v5, 0.0 }
 0x19c   : > { %v734_v0 = vmul.f32 %v3723_v6, %v701_v11  ;;  %925 = vst.msk [vmem:[#allocation2 + $0x70] sm:$0xf] %vm896_vm0, %v2481_v12  ;;  %v2484_v47 = vpack.c.bf16 %v767_v56, %v767_v56 }
 0x19d   : > { %v1273_v57 = vmul.f32 %v3725_v7, %v1240_v45  ;;  %2610 = vst [vmem:[#allocation3 + $0x70] sm:$0xff] %v2590_v61   ;;  %v1306_v14 = vadd.f32 %v1274_v48, %v1209_v13 }
 0x19e   : > { %v766_v1 = vadd.f32 %v734_v0, %v669_v3  ;;  %928 = vst.msk [vmem:[#allocation2 + $0x7c] sm:$0xf] %vm896_vm0, %v2484_v47 }
 0x19f   : > { %v1305_v17 = vadd.f32 %v1273_v57, %v1208_v37 }
 0x1a0   : > { %v2483_v18 = vpack.c.bf16 %v766_v1, %v766_v1 }
 0x1a1   : > { %v2595_v19 = vpack.c.bf16 %v1306_v14, %v1305_v17 }
 0x1a2   : > { %927 = vst.msk [vmem:[#allocation2 + $0x78] sm:$0xf] %vm896_vm0, %v2483_v18 }
 0x1a3   : > { %2611 = vst [vmem:[#allocation3 + $0x78] sm:$0xff] %v2595_v19  }
 0x1a4 PF: > { %s4205_s19 = sld [smem:[#allocation18_spill]]  ;;  %s2408_s24 = sshll.u32 %s3356_s11, 6  ;;  %vm1755_vm1 = vcmask 523264   ;;  %v3126_v58 = vld [vmem:[#allocation2 + $0x38] sm:$0xff]   ;;  %v3127_v30 = vld [vmem:[#allocation2 + $0x70] sm:$0xff]   ;;  %v3129_v39 = vld [vmem:[#allocation2 + $0x68] sm:$0xff]  }
 0x1a5   : > { %s3953_s7 = scalar_lea.vmem %s3567_s18, %s2408_s24 [#allocation4]  ;;  %v1790_v31 = vsel %vm1755_vm1, %v3126_v58, 0  ;;  %v3128_v32 = vld [vmem:[#allocation2 + $0x30] sm:$0xff]   ;;  %v3130_v23 = vld [vmem:[#allocation2 + $0x28] sm:$0xff]   ;;  %v3132_v38 = vld [vmem:[#allocation2 + $0x20] sm:$0xff]   ;;  %s4206_s30 = sld [smem:[#allocation19_spill]] }
 0x1a6   : > { %v1469_v22 = vld [vmem:[%s3953_s7] sm:$0xff]  ;;  %v1787_v8 = vsel %vm1755_vm1, %v3128_v32, 0  ;;  %v1784_v44 = vsel %vm1755_vm1, %v3130_v23, 0  ;;  %v1781_v9 = vsel %vm1755_vm1, %v3132_v38, 0  ;;  %v1470_v51 = vld [vmem:[%s3953_s7 + $0x8] sm:$0xff]  ;;  %v1471_v20 = vld [vmem:[%s3953_s7 + $0x10] sm:$0xff] }
 0x1a7   : > { %2988 = vmatprep.mubr.f32.mxu0 %v1469_v22  ;;  %v3131_v49 = vld [vmem:[#allocation2 + $0x60] sm:$0xff]   ;;  %v3133_v35 = vld [vmem:[#allocation2 + $0x58] sm:$0xff]   ;;  %v1474_v43 = vld [vmem:[%s3953_s7 + $0x28] sm:$0xff]  ;;  %s4207_s26 = sld [smem:[#allocation14_spill]]  ;;  %s2447_s21 = sshll.u32 %s3356_s11, 3 }
 0x1a8   : > { %v1472_v52 = vld [vmem:[%s3953_s7 + $0x18] sm:$0xff]  ;;  %v1473_v53 = vld [vmem:[%s3953_s7 + $0x20] sm:$0xff]  ;;  %v1475_v54 = vld [vmem:[%s3953_s7 + $0x30] sm:$0xff]  ;;  %s4208_s15 = sld [smem:[#allocation16_spill]]  ;;  %s2226_s23 = sshll.u32 %s3580_s16, 4  ;;  %s4096_s23 = int_to_ptr.vmem [resolvable:$true] %s2226_s23 }
 0x1a9   : > { %v3125_v29 = vld [vmem:[#allocation2 + $0x78] sm:$0xff]   ;;  %v3135_v60 = vld [vmem:[#allocation2 + $0x50] sm:$0xff]   ;;  %v3137_v27 = vld [vmem:[#allocation2 + $0x48] sm:$0xff]   ;;  %s4209_s1 = sld [smem:[#allocation23_spill]]  ;;  %s3248_s27 = scalar_lea.vmem %s4096_s23, 1024 }
 0x1aa   : > { %v1492_v6 = vld [vmem:[%s4205_s19 + $0x78] sm:$0xff]  ;;  %v1491_v7 = vld [vmem:[%s4205_s19 + $0x70] sm:$0xff]  ;;  %v1490_v15 = vld [vmem:[%s4205_s19 + $0x68] sm:$0xff]  ;;  %3000 = vmatprep.subr.msk.bf16.mxu1 %vm1755_vm1, %v3125_v29  ;;  %p3249_p3 = scmp.ne.s32.totalorder %s4096_s23, %s3248_s27  ;;  %s3378_s12 = smov [#allocation9]  }
 0x1ab   : > { %2956 = vmatprep.subr.mxu0 %v1492_v6  ;;  %v1489_v21 = vld [vmem:[%s4205_s19 + $0x60] sm:$0xff]  ;;  %v1488_v24 = vld [vmem:[%s4205_s19 + $0x58] sm:$0xff]  ;;  %v1487_v16 = vld [vmem:[%s4205_s19 + $0x50] sm:$0xff]  ;;  %2733 = vmatpush3.bf16.xpose.msra.mxu1 %v1790_v31 }
 0x1ac   : > { %2957 = vmatpush3.msra.mxu0 %v1492_v6  ;;  %v1486_v28 = vld [vmem:[%s4205_s19 + $0x48] sm:$0xff]  ;;  %v1485_v4 = vld [vmem:[%s4205_s19 + $0x40] sm:$0xff]  ;;  %3001 = vmatprep.subr.msk.bf16.mxu1 %vm1755_vm1, %v3127_v30  ;;  %v1484_v33 = vld [vmem:[%s4205_s19 + $0x38] sm:$0xff] }
 0x1ad   : > { %2958 = vmatprep.subr.mxu0 %v1491_v7  ;;  %v1483_v34 = vld [vmem:[%s4205_s19 + $0x30] sm:$0xff]  ;;  %v1482_v36 = vld [vmem:[%s4205_s19 + $0x28] sm:$0xff]  ;;  %v1481_v40 = vld [vmem:[%s4205_s19 + $0x20] sm:$0xff]  ;;  %s2448_s17 = sshll.u32 %s4207_s26, 5 }
 0x1ae   : > { %2959 = vmatpush3.msra.mxu0 %v1491_v7  ;;  %v1480_v42 = vld [vmem:[%s4205_s19 + $0x18] sm:$0xff]  ;;  %v1479_v25 = vld [vmem:[%s4205_s19 + $0x10] sm:$0xff]  ;;  %v1478_v50 = vld [vmem:[%s4205_s19 + $0x8] sm:$0xff]  ;;  %s2223_s18 = sadd.s32 %s2448_s17, %s2447_s21  ;;  %p4210_p10 = scmp.ne.s32.totalorder %s4208_s15, 0 }
 0x1af   : > { %2960 = vmatprep.subr.mxu0 %v1490_v15  ;;  %v1477_v26 = vld [vmem:[%s4205_s19] sm:$0xff]  ;;  %v3134_v46 = vld [vmem:[#allocation2 + $0x18] sm:$0xff]   ;;  %v3136_v62 = vld [vmem:[#allocation2 + $0x10] sm:$0xff]   ;;  %s2449_s8 = sshll.u32 %s2223_s18, 7 }
 0x1b0   : > { %2961 = vmatpush3.msra.mxu0 %v1490_v15  ;;  %v1778_v59 = vsel %vm1755_vm1, %v3134_v46, 0  ;;  %v1476_v55 = vld [vmem:[%s3953_s7 + $0x38] sm:$0xff]  ;;  %v1775_v63 = vsel %vm1755_vm1, %v3136_v62, 0  ;;  %v3138_v2 = vld [vmem:[#allocation2 + $0x8] sm:$0xff]   ;;  %v3139_v41 = vld [vmem:[#allocation2 + $0x40] sm:$0xff]   ;;  %s1605_s7 = sld [smem:[#allocation8]]  ;;  %s4094_s2 = scalar_lea.hbm %s4209_s1, %s2449_s8 }
 0x1b1   : > { %2962 = vmatprep.subr.mxu0 %v1489_v21  ;;  %v1772_v5 = vsel %vm1755_vm1, %v3138_v2, 0  ;;  %v3140_v10 = vld [vmem:[#allocation2] sm:$0xff]   ;;  %v3143_v62 = vld [vmem:[#allocation3 + $0x70] sm:$0xff]   ;;  %p3250_p12 = pnand %p3249_p3, %p4210_p10 }
 0x1b2   : > { %2963 = vmatpush3.msra.mxu0 %v1489_v21  ;;  %v1769_v11 = vsel %vm1755_vm1, %v3140_v10, 0  ;;  %v2409_v12 = vld [vmem:[%s4206_s30] ss:$0 sm:$0xff]  ;;  %s3252_s30 = sshll.u32 %s3378_s12, 4  ;;  %s3253_s30 = int_to_ptr.vmem [resolvable:$false] %s3252_s30 }
 0x1b3   : > { %2964 = vmatprep.subr.mxu0 %v1488_v24  ;;  %2735 = vmatpush3.bf16.xpose.msra.mxu1 %v1787_v8  ;;  %p3251_p0 = pneg %p3250_p12  ;;  %s3254_s26 = scalar_lea.vmem %s3253_s30, 2048 }
 0x1b4   : > { %2965 = vmatpush3.msra.mxu0 %v1488_v24  ;;  %3002 = vmatprep.subr.msk.bf16.mxu1 %vm1755_vm1, %v3129_v39  ;;  %p3255_p1 = scmp.lt.s32.totalorder %s4096_s23, %s3253_s30  ;;  %p3256_p2 = scmp.lt.s32.totalorder %s3254_s26, %s3248_s27 }
 0x1b5   : > { %2966 = vmatprep.subr.mxu0 %v1487_v16 }
 0x1b6   : > { %2967 = vmatpush3.msra.mxu0 %v1487_v16  ;;  %v1622_v3 = vstv %s1605_s7  ;;  %s4101_s7 = scalar_lea.sflag [#allocation6], %s349_s22  ;;  %p3257_p5 = por %p3256_p2, %p3255_p1 }
 0x1b7   : > { %2968 = vmatprep.subr.mxu0 %v1486_v28 }
 0x1b8   : > { %2969 = vmatpush3.msra.mxu0 %v1486_v28  ;;  %p3258_p8 = pnand %p3257_p5, %p3251_p0 }
 0x1b9   : > { %2970 = vmatprep.subr.mxu0 %v1485_v4 }
 0x1ba   : > { %2971 = vmatpush3.msra.mxu0 %v1485_v4 }
 0x1bb   : > { %2972 = vmatprep.subr.mxu0 %v1484_v33  ;;  %2737 = vmatpush3.bf16.xpose.msra.mxu1 %v1784_v44 }
 0x1bc   : > { %2973 = vmatpush3.msra.mxu0 %v1484_v33  ;;  %3003 = vmatprep.subr.msk.bf16.mxu1 %vm1755_vm1, %v3131_v49 }
 0x1bd   : > { %2974 = vmatprep.subr.mxu0 %v1483_v34 }
 0x1be   : > { %2975 = vmatpush3.msra.mxu0 %v1483_v34 }
 0x1bf   : > { %2976 = vmatprep.subr.mxu0 %v1482_v36 }
 0x1c0   : > { %2977 = vmatpush3.msra.mxu0 %v1482_v36 }
 0x1c1   : > { %2978 = vmatprep.subr.mxu0 %v1481_v40 }
 0x1c2   : > { %2979 = vmatpush3.msra.mxu0 %v1481_v40 }
 0x1c3   : > { %2980 = vmatprep.subr.mxu0 %v1480_v42  ;;  %2739 = vmatpush3.bf16.xpose.msra.mxu1 %v1781_v9 }
 0x1c4   : > { %2981 = vmatpush3.msra.mxu0 %v1480_v42  ;;  %3004 = vmatprep.subr.msk.bf16.mxu1 %vm1755_vm1, %v3133_v35 }
 0x1c5   : > { %2982 = vmatprep.subr.mxu0 %v1479_v25 }
 0x1c6   : > { %2983 = vmatpush3.msra.mxu0 %v1479_v25 }
 0x1c7   : > { %2984 = vmatprep.subr.mxu0 %v1478_v50 }
 0x1c8   : > { %2985 = vmatpush3.msra.mxu0 %v1478_v50 }
 0x1c9   : > { %2986 = vmatprep.subr.mxu0 %v1477_v26 }
 0x1ca   : > { %2987 = vmatpush3.msra.mxu0 %v1477_v26 }
 0x1cb   : > { %2989 = vmatmul.mubr.f32.vlgmr.msra.gmra.mxu0 %v1470_v51  ;;  %2741 = vmatpush3.bf16.xpose.msra.mxu1 %v1778_v59 }
 0x1cc   : > { %2991 = vmatprep.mubr.f32.mxu0 %v1471_v20  ;;  %3005 = vmatprep.subr.msk.bf16.mxu1 %vm1755_vm1, %v3135_v60  ;;  %v3141_v60 = vld [vmem:[#allocation3 + $0x78] sm:$0xff]  }
 0x1cd   : > { %2756 = vmatprep.subr.bf16.mxu0 %v3141_v60 }
 0x1cf   : > { %2992 = vmatmul.mubr.f32.gmra.mxu0 %v1472_v52 }
 0x1d0   : > { %2994 = vmatprep.mubr.f32.mxu0 %v1473_v53 }
 0x1d3   : > { %2995 = vmatmul.mubr.f32.gmra.mxu0 %v1474_v43  ;;  %2743 = vmatpush3.bf16.xpose.msra.mxu1 %v1775_v63  ;;  %v3144_v63 = vld [vmem:[#allocation3 + $0x30] sm:$0xff]  }
 0x1d4   : > { %2997 = vmatprep.mubr.f32.mxu0 %v1475_v54  ;;  %3006 = vmatprep.subr.msk.bf16.mxu1 %vm1755_vm1, %v3137_v27 }
 0x1d7   : > { %2998 = vmatmul.mubr.f32.gmra.mxu0 %v1476_v55  ;;  %v3142_v55 = vld [vmem:[#allocation3 + $0x38] sm:$0xff]  }
 0x1d8   : > { %2757 = vmatpush3.bf16.msra.mxu0 %v3142_v55 }
 0x1d9   : > { %2758 = vmatprep.subr.bf16.mxu0 %v3143_v62 }
 0x1db   : > { %2745 = vmatpush3.bf16.xpose.msra.mxu1 %v1772_v5 }
 0x1dc   : > { %3007 = vmatprep.subr.msk.bf16.mxu1 %vm1755_vm1, %v3139_v41  ;;  %2759 = vmatpush3.bf16.msra.mxu0 %v3144_v63 }
 0x1e3   : > { %2747 = vmatpush3.bf16.xpose.msra.mxu1 %v1769_v11 }
 0x28b   : > { %v2990_v56 = vpop.f32.mrf.mxu0 }
 0x28c   : > { %v1572_v48 = vadd.f32 %v2990_v56, %v2409_v12 }
 0x28d   : > { %v1566_v45 = vpop.f32.mrf.mxu0 }
 0x28e   : > { %v1615_v61 = vmin.f32 %v1572_v48, 0.0  ;;  %v1567_v0 = vadd.f32 %v2409_v12, %v1566_v45  ;;  %v1607_v6 = vmax.f32 %v1572_v48, 0.0 }
 0x28f   : > { %v2993_v47 = vpop.f32.mrf.mxu0 }
 0x290   : > { %v1614_v13 = vmin.f32 %v1567_v0, 0.0  ;;  %v1582_v37 = vadd.f32 %v2993_v47, %v2409_v12  ;;  %v1624_v57 = vmul.f32 %v1622_v3, %v1615_v61  ;;  %v1606_v7 = vmax.f32 %v1567_v0, 0.0  ;;  %v3145_v0 = vld [vmem:[#allocation3 + $0x68] sm:$0xff]  }
 0x291   : > { %v1576_v1 = vpop.f32.mrf.mxu0  ;;  %2760 = vmatprep.subr.bf16.mxu0 %v3145_v0 }
 0x292   : > { %v1623_v14 = vmul.f32 %v1622_v3, %v1614_v13  ;;  %v1609_v17 = vmax.f32 %v1582_v37, 0.0  ;;  %v1617_v18 = vmin.f32 %v1582_v37, 0.0  ;;  %v1577_v19 = vadd.f32 %v2409_v12, %v1576_v1  ;;  %v3146_v13 = vld [vmem:[#allocation3 + $0x28] sm:$0xff]   ;;  %v3147_v1 = vld [vmem:[#allocation3 + $0x60] sm:$0xff]  }
 0x293   : > { %v2996_v15 = vpop.f32.mrf.mxu0  ;;  %v1632_v29 = vadd.f32 %v1624_v57, %v1607_v6  ;;  %2761 = vmatpush3.bf16.msra.mxu0 %v3146_v13  ;;  %v3149_v6 = vld [vmem:[#allocation3 + $0x58] sm:$0xff]  }
 0x294   : > { %v1626_v21 = vmul.f32 %v1622_v3, %v1617_v18  ;;  %v1608_v22 = vmax.f32 %v1577_v19, 0.0  ;;  %v1616_v24 = vmin.f32 %v1577_v19, 0.0  ;;  %v1592_v16 = vadd.f32 %v2996_v15, %v2409_v12  ;;  %2762 = vmatprep.subr.bf16.mxu0 %v3147_v1  ;;  %v3150_v15 = vld [vmem:[#allocation3 + $0x18] sm:$0xff]  }
 0x295   : > { %v1631_v28 = vadd.f32 %v1623_v14, %v1606_v7  ;;  %v1586_v58 = vpop.f32.mrf.mxu0 }
 0x296   : > { %v1634_v30 = vadd.f32 %v1626_v21, %v1609_v17  ;;  %v1625_v31 = vmul.f32 %v1622_v3, %v1616_v24  ;;  %v1619_v4 = vmin.f32 %v1592_v16, 0.0  ;;  %v1611_v32 = vmax.f32 %v1592_v16, 0.0  ;;  %v3148_v17 = vld [vmem:[#allocation3 + $0x20] sm:$0xff]   ;;  %v3151_v24 = vld [vmem:[#allocation3 + $0x50] sm:$0xff]  }
 0x297   : > { %v1639_v33 = vpack.c.bf16 %v1632_v29, %v1631_v28  ;;  %v1587_v34 = vadd.f32 %v2409_v12, %v1586_v58  ;;  %v2999_v36 = vpop.f32.mrf.mxu0  ;;  %2763 = vmatpush3.bf16.msra.mxu0 %v3148_v17  ;;  %v3152_v28 = vld [vmem:[#allocation3 + $0x10] sm:$0xff]  }
 0x298   : > { %v1633_v8 = vadd.f32 %v1625_v31, %v1608_v22  ;;  %v1628_v39 = vmul.f32 %v1622_v3, %v1619_v4  ;;  %v1602_v23 = vadd.f32 %v2999_v36, %v2409_v12  ;;  %2764 = vmatprep.subr.bf16.mxu0 %v3149_v6  ;;  %v3154_v31 = vld [vmem:[#allocation3 + $0x8] sm:$0xff]   ;;  %v3155_v4 = vld [vmem:[#allocation3 + $0x40] sm:$0xff]  }
 0x299   : > { %2748 = vmatprep.mubr.msk.bf16.mxu1 %vm1755_vm1, %v1639_v33  ;;  %v1610_v38 = vmax.f32 %v1587_v34, 0.0  ;;  %v1618_v40 = vmin.f32 %v1587_v34, 0.0  ;;  %v1596_v42 = vpop.f32.mrf.mxu0 }
 0x29a   : > { %v1640_v25 = vpack.c.bf16 %v1634_v30, %v1633_v8  ;;  %2749 = vmatmul.mubr.msk.bf16.vlgmr.msra.gmra.mxu1 %vm1755_vm1, %v1639_v33  ;;  %v1636_v44 = vadd.f32 %v1628_v39, %v1611_v32  ;;  %v1621_v9 = vmin.f32 %v1602_v23, 0.0  ;;  %v1597_v50 = vadd.f32 %v2409_v12, %v1596_v42  ;;  %v3153_v30 = vld [vmem:[#allocation3 + $0x48] sm:$0xff]   ;;  %v3156_v32 = vld [vmem:[#allocation3] sm:$0xff]  }
 0x29b   : > { %v1627_v49 = vmul.f32 %v1622_v3, %v1618_v40  ;;  %v1613_v20 = vmax.f32 %v1602_v23, 0.0  ;;  %2765 = vmatpush3.bf16.msra.mxu0 %v3150_v15 }
 0x29c   : > { %2750 = vmatprep.mubr.msk.bf16.mxu1 %vm1755_vm1, %v1640_v25  ;;  %v1620_v51 = vmin.f32 %v1597_v50, 0.0  ;;  %v1630_v52 = vmul.f32 %v1622_v3, %v1621_v9  ;;  %v1612_v53 = vmax.f32 %v1597_v50, 0.0  ;;  %2766 = vmatprep.subr.bf16.mxu0 %v3151_v24 }
 0x29d   : > { %v1635_v26 = vadd.f32 %v1627_v49, %v1610_v38 }
 0x29e   : > { %v1629_v46 = vmul.f32 %v1622_v3, %v1620_v51  ;;  %v1638_v43 = vadd.f32 %v1630_v52, %v1613_v20 }
 0x29f   : > { %v1641_v35 = vpack.c.bf16 %v1636_v44, %v1635_v26  ;;  %2767 = vmatpush3.bf16.msra.mxu0 %v3152_v28 }
 0x2a0   : > { %v1637_v54 = vadd.f32 %v1629_v46, %v1612_v53  ;;  %2768 = vmatprep.subr.bf16.mxu0 %v3153_v30 }
 0x2a2   : > { %2751 = vmatmul.mubr.msk.bf16.gmra.mxu1 %vm1755_vm1, %v1640_v25  ;;  %v1642_v59 = vpack.c.bf16 %v1638_v43, %v1637_v54 }
 0x2a3   : > { %2752 = vmatprep.mubr.msk.bf16.mxu1 %vm1755_vm1, %v1641_v35  ;;  %2769 = vmatpush3.bf16.msra.mxu0 %v3154_v31 }
 0x2a4   : > { %2770 = vmatprep.subr.bf16.mxu0 %v3155_v4 }
 0x2a7   : > { %2771 = vmatpush3.bf16.msra.mxu0 %v3156_v32 }
 0x2aa   : > { %2753 = vmatmul.mubr.msk.bf16.gmra.mxu1 %vm1755_vm1, %v1641_v35 }
 0x2ab   : > { %2754 = vmatprep.mubr.msk.bf16.mxu1 %vm1755_vm1, %v1642_v59 }
 0x2b2   : > { %2755 = vmatmul.mubr.msk.bf16.gmra.mxu1 %vm1755_vm1, %v1642_v59 }
 0x35a   : > { %v1850_v27 = vpop.f32.mrf.mxu1 }
 0x35c   : > { %v1852_v2 = vpop.f32.mrf.mxu1 }
 0x35d   : > { %v1889_v5 = vmax.f32 %v1850_v27, %v1852_v2 }
 0x35e   : > { %v4029_v41 = vpop.f32.mrf.mxu1 }
 0x35f   : > { %1890 = vmax.xlane.f32.xlu0 %v1889_v5 }
 0x360   : > { %v1856_v10 = vpop.f32.mrf.mxu1 }
 0x361   : > { %v1892_v11 = vmax.f32 %v4029_v41, %v1856_v10 }
 0x362   : > { %v4032_v12 = vpop.f32.mrf.mxu1 }
 0x363   : > { %1893 = vmax.xlane.f32.xlu0 %v1892_v11 }
 0x364   : > { %v4034_v56 = vpop.f32.mrf.mxu1 }
 0x365   : > { %v1895_v48 = vmax.f32 %v4032_v12, %v4034_v56 }
 0x366   : > { %v4038_v45 = vpop.f32.mrf.mxu1 }
 0x367   : > { %1896 = vmax.xlane.f32.xlu1 %v1895_v48 }
 0x368   : > { %v4040_v61 = vpop.f32.mrf.mxu1 }
 0x369   : > { %v1898_v3 = vmax.f32 %v4038_v45, %v4040_v61 }
 0x36a   : > { %v4044_v47 = vpop.f32.mrf.mxu1 }
 0x36b   : > { %1899 = vmax.xlane.f32.xlu1 %v1898_v3 }
 0x36c   : > { %v4046_v37 = vpop.f32.mrf.mxu1 }
 0x36d   : > { %v1901_v57 = vmax.f32 %v4044_v47, %v4046_v37 }
 0x36e   : > { %v4050_v14 = vpop.f32.mrf.mxu1 }
 0x36f   : > { %1902 = vmax.xlane.f32.xlu0 %v1901_v57 }
 0x370   : > { %v4052_v18 = vpop.f32.mrf.mxu1 }
 0x371   : > { %v1904_v19 = vmax.f32 %v4050_v14, %v4052_v18 }
 0x372   : > { %v4056_v7 = vpop.f32.mrf.mxu1 }
 0x373   : > { %1905 = vmax.xlane.f32.xlu1 %v1904_v19 }
 0x374   : > { %v4058_v21 = vpop.f32.mrf.mxu1 }
 0x375   : > { %v1907_v22 = vmax.f32 %v4056_v7, %v4058_v21 }
 0x376   : > { %v4062_v16 = vpop.f32.mrf.mxu1 }
 0x377   : > { %1908 = vmax.xlane.f32.xlu0 %v1907_v22 }
 0x378   : > { %v4064_v29 = vpop.f32.mrf.mxu1 }
 0x379   : > { %v1910_v58 = vmax.f32 %v4062_v16, %v4064_v29 }
 0x37b   : > { %1911 = vmax.xlane.f32.xlu1 %v1910_v58 }
 0x3e8   : > { %v1891_v33 = vpop.xlane.xlu0 %1890 }
 0x3e9   : > { %v1913_v34 = vsub.f32 %v1850_v27, %v1891_v33  ;;  %v1914_v36 = vsub.f32 %v1852_v2, %v1891_v33 }
 0x3eb   : > { %v1929_v8 = vmul.f32 1.442695, %v1913_v34  ;;  %v1931_v39 = vmul.f32 1.442695, %v1914_v36 }
 0x3ec   : > { %v1894_v23 = vpop.xlane.xlu0 %1893 }
 0x3ed   : > { %3157 = vpow2.f32 %v1929_v8  ;;  %v1915_v38 = vsub.f32 %v4029_v41, %v1894_v23  ;;  %v1916_v40 = vsub.f32 %v1856_v10, %v1894_v23 }
 0x3ee   : > { %3159 = vpow2.f32 %v1931_v39 }
 0x3ef   : > { %v1933_v42 = vmul.f32 1.442695, %v1915_v38  ;;  %v1935_v25 = vmul.f32 1.442695, %v1916_v40 }
 0x3f0   : > { %v1897_v44 = vpop.xlane.xlu1 %1896 }
 0x3f1   : > { %3161 = vpow2.f32 %v1933_v42  ;;  %v1917_v49 = vsub.f32 %v4032_v12, %v1897_v44  ;;  %v1918_v9 = vsub.f32 %v4034_v56, %v1897_v44 }
 0x3f2   : > { %3163 = vpow2.f32 %v1935_v25 }
 0x3f3   : > { %v1937_v50 = vmul.f32 1.442695, %v1917_v49  ;;  %v1939_v26 = vmul.f32 1.442695, %v1918_v9 }
 0x3f4   : > { %v1900_v51 = vpop.xlane.xlu1 %1899 }
 0x3f5   : > { %3165 = vpow2.f32 %v1937_v50  ;;  %v1919_v20 = vsub.f32 %v4038_v45, %v1900_v51  ;;  %v1920_v35 = vsub.f32 %v4040_v61, %v1900_v51 }
 0x3f6   : > { %3167 = vpow2.f32 %v1939_v26 }
 0x3f7   : > { %v1941_v52 = vmul.f32 1.442695, %v1919_v20  ;;  %v1943_v53 = vmul.f32 1.442695, %v1920_v35 }
 0x3f8   : > { %v1903_v46 = vpop.xlane.xlu0 %1902 }
 0x3f9   : > { %3169 = vpow2.f32 %v1941_v52  ;;  %v1921_v43 = vsub.f32 %v4044_v47, %v1903_v46  ;;  %v1922_v54 = vsub.f32 %v4046_v37, %v1903_v46 }
 0x3fa   : > { %v3158_v59 = vpop.eup %3157  ;;  %3171 = vpow2.f32 %v1943_v53 }
 0x3fb   : > { %v3160_v60 = vpop.eup %3159  ;;  %v1945_v55 = vmul.f32 1.442695, %v1921_v43  ;;  %v1947_v62 = vmul.f32 1.442695, %v1922_v54 }
 0x3fc   : > { %v1906_v63 = vpop.xlane.xlu1 %1905  ;;  %v1961_v27 = vadd.f32 %v3160_v60, %v3158_v59 }
 0x3fd   : > { %3173 = vpow2.f32 %v1945_v55  ;;  %v1923_v2 = vsub.f32 %v4050_v14, %v1906_v63  ;;  %v1924_v5 = vsub.f32 %v4052_v18, %v1906_v63 }
 0x3fe   : > { %v3162_v41 = vpop.eup %3161  ;;  %3175 = vpow2.f32 %v1947_v62  ;;  %1962 = vadd.xlane.f32.xlu0 %v1961_v27 }
 0x3ff   : > { %v3164_v10 = vpop.eup %3163  ;;  %v1949_v11 = vmul.f32 1.442695, %v1923_v2  ;;  %v1951_v12 = vmul.f32 1.442695, %v1924_v5  ;;  %v1985_v56 = vpack.c.bf16 %v3162_v41, %v3158_v59 }
 0x400   : > { %v1909_v48 = vpop.xlane.xlu0 %1908  ;;  %v1986_v45 = vpack.c.bf16 %v3164_v10, %v3160_v60  ;;  %v1964_v61 = vadd.f32 %v3164_v10, %v3162_v41 }
 0x401   : > { %3177 = vpow2.f32 %v1949_v11  ;;  %v1925_v3 = vsub.f32 %v4056_v7, %v1909_v48  ;;  %v1926_v0 = vsub.f32 %v4058_v21, %v1909_v48 }
 0x402   : > { %v3166_v47 = vpop.eup %3165  ;;  %3179 = vpow2.f32 %v1951_v12  ;;  %2153 = vmatprep.mubr.bf16.mxu0 %v1986_v45  ;;  %1965 = vadd.xlane.f32.xlu1 %v1964_v61 }
 0x403   : > { %v3168_v13 = vpop.eup %3167  ;;  %v1953_v37 = vmul.f32 1.442695, %v1925_v3  ;;  %v1955_v57 = vmul.f32 1.442695, %v1926_v0  ;;  %2154 = vmatmul.mubr.bf16.vlgmr.msra.gmra.mxu0 %v1985_v56 }
 0x404   : > { %v1912_v1 = vpop.xlane.xlu1 %1911  ;;  %v1967_v14 = vadd.f32 %v3168_v13, %v3166_v47 }
 0x405   : > { %3181 = vpow2.f32 %v1953_v37  ;;  %v1927_v17 = vsub.f32 %v4062_v16, %v1912_v1  ;;  %v1928_v18 = vsub.f32 %v4064_v29, %v1912_v1 }
 0x406   : > { %v3170_v19 = vpop.eup %3169  ;;  %3183 = vpow2.f32 %v1955_v57  ;;  %1968 = vadd.xlane.f32.xlu0 %v1967_v14 }
 0x407   : > { %v3172_v6 = vpop.eup %3171  ;;  %v1957_v7 = vmul.f32 1.442695, %v1927_v17  ;;  %v1959_v15 = vmul.f32 1.442695, %v1928_v18  ;;  %v1987_v21 = vpack.c.bf16 %v3170_v19, %v3166_v47 }
 0x408   : > { %v1988_v22 = vpack.c.bf16 %v3172_v6, %v3168_v13  ;;  %v1970_v24 = vadd.f32 %v3172_v6, %v3170_v19 }
 0x409   : > { %3185 = vpow2.f32 %v1957_v7 }
 0x40a   : > { %v3174_v28 = vpop.eup %3173  ;;  %3187 = vpow2.f32 %v1959_v15  ;;  %2161 = vmatprep.mubr.bf16.mxu0 %v1988_v22  ;;  %1971 = vadd.xlane.f32.xlu1 %v1970_v24 }
 0x40b   : > { %v3176_v58 = vpop.eup %3175  ;;  %2162 = vmatmul.mubr.bf16.gmra.mxu0 %v1987_v21 }
 0x40c   : > { %v1973_v30 = vadd.f32 %v3176_v58, %v3174_v28 }
 0x40e   : > { %v3178_v16 = vpop.eup %3177  ;;  %1974 = vadd.xlane.f32.xlu0 %v1973_v30 }
 0x40f   : > { %v3180_v29 = vpop.eup %3179  ;;  %v1989_v31 = vpack.c.bf16 %v3178_v16, %v3174_v28 }
 0x410   : > { %v1990_v4 = vpack.c.bf16 %v3180_v29, %v3176_v58  ;;  %v1976_v32 = vadd.f32 %v3180_v29, %v3178_v16 }
 0x412   : > { %v3182_v33 = vpop.eup %3181  ;;  %2169 = vmatprep.mubr.bf16.mxu0 %v1990_v4  ;;  %1977 = vadd.xlane.f32.xlu1 %v1976_v32 }
 0x413   : > { %v3184_v34 = vpop.eup %3183  ;;  %2170 = vmatmul.mubr.bf16.gmra.mxu0 %v1989_v31 }
 0x414   : > { %v1979_v36 = vadd.f32 %v3184_v34, %v3182_v33 }
 0x416   : > { %v3186_v8 = vpop.eup %3185  ;;  %1980 = vadd.xlane.f32.xlu0 %v1979_v36 }
 0x417   : > { %v3188_v39 = vpop.eup %3187  ;;  %v1991_v23 = vpack.c.bf16 %v3186_v8, %v3182_v33 }
 0x418   : > { %v1992_v38 = vpack.c.bf16 %v3188_v39, %v3184_v34  ;;  %v1982_v40 = vadd.f32 %v3188_v39, %v3186_v8 }
 0x41a   : > { %2177 = vmatprep.mubr.bf16.mxu0 %v1992_v38  ;;  %1983 = vadd.xlane.f32.xlu1 %v1982_v40 }
 0x41b   : > { %2178 = vmatmul.mubr.bf16.gmra.mxu0 %v1991_v23 }
 0x487   : > { %v1963_v42 = vpop.xlane.xlu0 %1962 }
 0x488   : > { %3189 = vrcp.f32 %v1963_v42 }
 0x48b   : > { %v1966_v25 = vpop.xlane.xlu1 %1965 }
 0x48c   : > { %3191 = vrcp.f32 %v1966_v25 }
 0x48f   : > { %v1969_v44 = vpop.xlane.xlu0 %1968 }
 0x490   : > { %3193 = vrcp.f32 %v1969_v44 }
 0x493   : > { %v1972_v49 = vpop.xlane.xlu1 %1971 }
 0x494   : > { %3195 = vrcp.f32 %v1972_v49 }
 0x495   : > { %v3190_v51 = vpop.eup %3189 }
 0x497   : > { %v1975_v20 = vpop.xlane.xlu0 %1974 }
 0x498   : > { %3197 = vrcp.f32 %v1975_v20 }
 0x499   : > { %v3192_v43 = vpop.eup %3191 }
 0x49b   : > { %v1978_v54 = vpop.xlane.xlu1 %1977 }
 0x49c   : > { %3199 = vrcp.f32 %v1978_v54 }
 0x49d   : > { %v3194_v63 = vpop.eup %3193 }
 0x49f   : > { %v1981_v27 = vpop.xlane.xlu0 %1980 }
 0x4a0   : > { %3201 = vrcp.f32 %v1981_v27 }
 0x4a1   : > { %v3196_v11 = vpop.eup %3195 }
 0x4a3   : > { %v1984_v12 = vpop.xlane.xlu1 %1983 }
 0x4a4   : > { %3203 = vrcp.f32 %v1984_v12 }
 0x4a5   : > { %v3198_v3 = vpop.eup %3197 }
 0x4a9   : > { %v3200_v57 = vpop.eup %3199 }
 0x4ad   : > { %v3202_v19 = vpop.eup %3201 }
 0x4b1   : > { %v3204_v22 = vpop.eup %3203 }
 0x4c3   : > { %v2772_v9 = vpop.f32.mrf.mxu0 }
 0x4c5   : > { %v2773_v50 = vpop.f32.mrf.mxu0 }
 0x4c6   : > { %v2774_v26 = vadd.f32 %v2773_v50, %v2772_v9 }
 0x4c7   : > { %v2775_v35 = vpop.f32.mrf.mxu0 }
 0x4c8   : > { %v2194_v52 = vmul.f32 %v3190_v51, %v2774_v26 }
 0x4c9   : > { %v2776_v53 = vpop.f32.mrf.mxu0 }
 0x4ca   : > { %2202 = vst [vmem:[%s3580_s16] sm:$0xff] %v2194_v52  ;;  %v2777_v46 = vadd.f32 %v2776_v53, %v2775_v35 }
 0x4cb   : > { %v2778_v59 = vpop.f32.mrf.mxu0 }
 0x4cc   : > { %v2195_v60 = vmul.f32 %v3192_v43, %v2777_v46 }
 0x4cd   : > { %v2779_v55 = vpop.f32.mrf.mxu0 }
 0x4ce   : > { %2203 = vst [vmem:[%s3580_s16 + $0x8] sm:$0xff] %v2195_v60  ;;  %v2780_v62 = vadd.f32 %v2779_v55, %v2778_v59 }
 0x4cf   : > { %v2781_v2 = vpop.f32.mrf.mxu0 }
 0x4d0   : > { %v2196_v5 = vmul.f32 %v3194_v63, %v2780_v62 }
 0x4d1   : > { %v2782_v41 = vpop.f32.mrf.mxu0 }
 0x4d2   : > { %2204 = vst [vmem:[%s3580_s16 + $0x10] sm:$0xff] %v2196_v5  ;;  %v2783_v10 = vadd.f32 %v2782_v41, %v2781_v2 }
 0x4d3   : > { %v2784_v56 = vpop.f32.mrf.mxu0 }
 0x4d4   : > { %v2197_v48 = vmul.f32 %v3196_v11, %v2783_v10 }
 0x4d5   : > { %v2785_v45 = vpop.f32.mrf.mxu0 }
 0x4d6   : > { %2205 = vst [vmem:[%s3580_s16 + $0x18] sm:$0xff] %v2197_v48  ;;  %v2786_v61 = vadd.f32 %v2785_v45, %v2784_v56 }
 0x4d7   : > { %v2787_v0 = vpop.f32.mrf.mxu0 }
 0x4d8   : > { %v2198_v47 = vmul.f32 %v3198_v3, %v2786_v61 }
 0x4d9   : > { %v2788_v13 = vpop.f32.mrf.mxu0 }
 0x4da   : > { %2206 = vst [vmem:[%s3580_s16 + $0x20] sm:$0xff] %v2198_v47  ;;  %v2789_v37 = vadd.f32 %v2788_v13, %v2787_v0 }
 0x4db   : > { %v2790_v1 = vpop.f32.mrf.mxu0 }
 0x4dc   : > { %v2199_v14 = vmul.f32 %v3200_v57, %v2789_v37 }
 0x4dd   : > { %v2791_v17 = vpop.f32.mrf.mxu0 }
 0x4de   : > { %2207 = vst [vmem:[%s3580_s16 + $0x28] sm:$0xff] %v2199_v14  ;;  %v2792_v18 = vadd.f32 %v2791_v17, %v2790_v1 }
 0x4df   : > { %v2793_v6 = vpop.f32.mrf.mxu0 }
 0x4e0   : > { %v2200_v7 = vmul.f32 %v3202_v19, %v2792_v18 }
 0x4e1   : > { %v2794_v15 = vpop.f32.mrf.mxu0 }
 0x4e2   : > { %2208 = vst [vmem:[%s3580_s16 + $0x30] sm:$0xff] %v2200_v7  ;;  %v2795_v21 = vadd.f32 %v2794_v15, %v2793_v6 }
 0x4e4   : > { %v2201_v24 = vmul.f32 %v3204_v22, %v2795_v21 }
 0x4e6   : > { %2209 = vst [vmem:[%s3580_s16 + $0x38] sm:$0xff] %v2201_v24 }
 0x4e7   : > { %3261 = shalt.err (!%p3258_p8)
}
 0x4e8   : > { %s3262_s22 = scalar_lea.hbm %s4094_s2, 1024  ;;  %s3266_s17 = scalar_lea.hbm %s4209_s1, 8192 }
 0x4e9   : > { %p3263_p9 = scmp.ne.s32.totalorder %s4094_s2, %s3262_s22  ;;  %p3267_p4 = scmp.lt.s32.totalorder %s4094_s2, %s4209_s1 }
 0x4ea   : > { %p3268_p6 = scmp.lt.s32.totalorder %s3266_s17, %s3262_s22 }
 0x4eb   : > { %p3264_p11 = pnand %p3263_p9, %p4210_p10 }
 0x4ec   : > { %p3269_p7 = por %p3268_p6, %p3267_p4 }
 0x4ed   : > { %p3265_p13 = pneg %p3264_p11 }
 0x4ef   : > { %p3270_p3 = pnand %p3269_p7, %p3265_p13 }
 0x4f1   : > { %3273 = shalt.err (!%p3270_p3)
}
 0x4f2   : > { %s3379_s11 = smov 128   ;;  %s3380_s24 = smov 8  }
 0x4f3   : > { %3014 = dma.vmem_to_hbm [thread:$0]  (%p4210_p10), %s4096_s23, 1024, %s4094_s2, %s4101_s7, %s3379_s11, %s3379_s11, %s3380_s24  }
 0x4f4 PF: > { %s4211_s27 = sld [smem:[#allocation15_spill]] }
 0x4f5   : > { %s4212_s12 = sld [smem:[#allocation13_spill]] }
 0x4f6   : > { %s4213_s30 = sld [smem:[#allocation17_spill]] }
 0x4fa   : > { %p3031_p12 = scmp.ge.s32.totalorder %s4211_s27, 2 }
 0x4fb   : > { %s2241_s26 = sand.u32 1, %s4212_s12  }
 0x4fc   : > { %p4214_p0 = scmp.ne.s32.totalorder %s4213_s30, 0  ;;  %s2242_s22 = scalar_lea.sflag [#allocation6], %s2241_s26 }
 0x4fe   : > { %p3025_p1 = pnand %p3031_p12, %p4214_p0 }
 0x500   : > { %p3026_p2 = pneg %p3025_p1 }
 0x502   : > { %3327 = dma.done.wait (%p3026_p2), %s2242_s22, 1024  }
 0x503   : > { %3329 = vsyncadd (%p3026_p2), %s2242_s22, 4294966272  ;;  %s25_s15 = sadd.s32 1, %s4211_s27   ;;  %s4215_s27 = smov %s3336_s28 }
 0x504   : > { %p22_p5 = scmp.ge.s32.totalorder %s25_s15, 10   ;;  %s4216_s28 = smov %s3340_s29 }
 0x505   : > { %s4217_s29 = smov %s3557_s4  ;;  %s4218_s30 = smov %s3348_s9 }
 0x506   : > { %s4219_s9 = smov %s3352_s10  ;;  %s4220_s10 = smov %s3554_s6 }
 0x507   : > { %s4221_s11 = smov %s3364_s13  ;;  %s4222_s12 = smov %s3368_s14 }
 0x508   : > { %s4223_s13 = smov %s4226_s20  ;;  %s4224_s14 = smov %s4230_s25 }
 0x509   :  { %24 = sbr.rel (!%p22_p5) target bundleno = 17 (0x11), region = 107 }
 0x50e   :  { %2247 = vsyncpa [#allocation5], 1 }
 0x50f   :  { %2249 = vsyncpa [#allocation5 + $0x1], 1 }
 0x510   :  { %2250 = vsyncpa [#allocation6], 1 }
 0x511   :  { %2252 = vsyncpa [#allocation6 + $0x1], 1 }
 0x512   :  { %2253 = vsyncpa [#allocation7], 1 }
 0x513   :  { %2255 = vsyncpa [#allocation7 + $0x1], 1 }

</bundles_post_ra>
